<compile_context>
chip_gen: v7x
topology: tpu7x:2x2x1
jax: 0.10.0
libtpu: 0.0.40
codegen_flags: <defaults>
</compile_context>

<pallas_src>
import functools

import jax
import jax.numpy as jnp
from jax.experimental import pallas as pl
from jax.experimental.pallas import tpu as pltpu


def _clamped_kernel(x_ref, o_ref, *, k):
    x = x_ref[...]
    # tanh -> EUP slot, mul/min -> VPU slots: both are free filler under the
    # streaming DMA, so no compute-side optimization is needed.
    o_ref[...] = jnp.minimum(x * jnp.tanh(k * x), x)


_LANE_CANDIDATES = (4096, 2048, 1024, 512, 256, 128)
_SMALL_BYTES = 1 << 20   # below this, fused XLA elementwise wins (launch cost dominates)
_SUBLANE = 16            # multiple of 16 sublanes covers f32 (8,128) and bf16 (16,128)


def _round_up(v, m):
    return ((v + m - 1) // m) * m


def _tile_budget():
    """(per-block byte budget, scoped-VMEM override) scaled to the chip."""
    try:
        info = pltpu.get_tpu_info()
        if info.vmem_capacity_bytes <= (64 << 20):
            # v7x-class: 64 MiB VMEM/TC but ~3.2 TB/s HBM -> 8 MiB blocks keep
            # the fixed ~0.35 us/step grid overhead well under 10% of the DMA
            # time.  4 double-buffered 8 MiB buffers need ~33 MiB, so raise the
            # scoped-VMEM limit (physical VMEM is 64 MiB -> plenty of headroom).
            return 8 << 20, 48 << 20
    except Exception:
        pass
    # v5e / v6e: 2 MiB blocks already hide the per-step overhead at <=1.4 TB/s
    # HBM, and 4 x ~2 MiB double-buffered fits v5e's 16 MiB default scoped VMEM.
    return 2 << 20, None


def clamped_layer(x, k):
    """Pallas TPU implementation of ClampedLayer.forward: min(x*tanh(k*x), x)."""
    # k is a static module attribute; a traced/learned k would instead be
    # passed to the kernel as an SMEM scalar.
    k = float(k)
    dtype = x.dtype
    orig_shape = x.shape
    total = x.size
    itemsize = jnp.dtype(dtype).itemsize
    total_bytes = total * itemsize

    # Tiny activations: skip Pallas entirely (XLA fuses this elementwise op
    # into its producer/consumer, avoiding the HBM round trip).
    if total_bytes < _SMALL_BYTES:
        return clamped_layer_ref(x, k)

    tile_bytes, vmem_limit = _tile_budget()
    compiler_params = pltpu.CompilerParams(
        dimension_semantics=("parallel",),   # lets megacore chips split the grid
        vmem_limit_bytes=vmem_limit,
    )
    cost = pl.CostEstimate(
        flops=3 * total,
        transcendentals=total,
        bytes_accessed=2 * total_bytes,
    )
    kernel = functools.partial(_clamped_kernel, k=k)
    flat = jnp.ravel(x)

    # Widest lane width (multiple of 128) that evenly divides the element
    # count -> lane-dense 2-D slab, unmasked wide stores, no padding needed.
    lanes = next((c for c in _LANE_CANDIDATES if total % c == 0), None)

    if lanes is not None:
        rows = total // lanes
        x2d = flat.reshape(rows, lanes)
        target_rows = max(_SUBLANE, tile_bytes // (lanes * itemsize))
        # At least 2 (and an even number of) grid steps so both v7x
        # TensorCores participate even when one block would cover the array.
        num_blocks = max(2, pl.cdiv(rows, target_rows))
        num_blocks += num_blocks % 2
        tile_rows = min(rows, _round_up(pl.cdiv(rows, num_blocks), _SUBLANE))
        grid = (pl.cdiv(rows, tile_rows),)

        out2d = pl.pallas_call(
            kernel,
            out_shape=jax.ShapeDtypeStruct((rows, lanes), dtype),
            grid_spec=pltpu.PrefetchScalarGridSpec(
                num_scalar_prefetch=0,
                grid=grid,
                in_specs=[pl.BlockSpec((tile_rows, lanes), lambda i: (i, 0))],
                out_specs=pl.BlockSpec((tile_rows, lanes), lambda i: (i, 0)),
            ),
            compiler_params=compiler_params,
            cost_estimate=cost,
        )(x2d)
        return out2d.reshape(orig_shape)

    # No multiple of 128 divides x.size: stream the flat 1-D array directly
    # and let Pallas mask the partial final block.  No pad / slice HBM passes.
    target_elems = max(1024, tile_bytes // itemsize)
    num_blocks = max(2, pl.cdiv(total, target_elems))
    num_blocks += num_blocks % 2
    tile_elems = _round_up(pl.cdiv(total, num_blocks), 1024)  # (8,128)-aligned
    grid = (pl.cdiv(total, tile_elems),)

    out_flat = pl.pallas_call(
        kernel,
        out_shape=jax.ShapeDtypeStruct((total,), dtype),
        grid_spec=pltpu.PrefetchScalarGridSpec(
            num_scalar_prefetch=0,
            grid=grid,
            in_specs=[pl.BlockSpec((tile_elems,), lambda i: (i,))],
            out_specs=pl.BlockSpec((tile_elems,), lambda i: (i,)),
        ),
        compiler_params=compiler_params,
        cost_estimate=cost,
    )(flat)
    return out_flat.reshape(orig_shape)


def clamped_layer_ref(x, k):
    """Pure-JAX reference matching the PyTorch module semantics."""
    return jnp.minimum(x * jnp.tanh(k * x), x)


if __name__ == "__main__":
    key = jax.random.PRNGKey(0)
    k = 2.5  # ClampedLayer(k=2.5)
    k0, k1, k2 = jax.random.split(key, 3)

    # 1) Small NCHW conv activation (the module's typical input) -> jnp fast path.
    x_small = jax.random.normal(k0, (2, 4, 16, 16), dtype=jnp.float32)
    # 2) Larger activation, size divisible by 128 -> 2-D lane-dense Pallas path.
    x_big = jax.random.normal(k1, (8, 16, 64, 64), dtype=jnp.float32)     # 2 MiB
    # 3) Size NOT divisible by 128 -> 1-D masked Pallas path (no pad / slice).
    x_odd = jax.random.normal(k2, (1_000_003,), dtype=jnp.float32)        # ~3.8 MiB

    for x in (x_small, x_big, x_odd):
        out = jax.block_until_ready(clamped_layer(x, k))
        ref = clamped_layer_ref(x, k)
        assert out.shape == x.shape and out.dtype == x.dtype
        assert jnp.allclose(out, ref, atol=1e-5, rtol=1e-5), "mismatch vs reference"

    print("KERNEL_OK")
</pallas_src>

<mosaic_0001>
module attributes {stable_mosaic.version = 11 : i64} {
  func.func @_clamped_kernel(%arg0: i32, %arg1: memref<64x4096xf32, #tpu.memory_space<vmem>>, %arg2: memref<64x4096xf32, #tpu.memory_space<vmem>>) attributes {dimension_semantics = [#tpu.dimension_semantics<parallel>], iteration_bounds = array<i64: 2>, scalar_prefetch = 0 : i64, scratch_operands = 0 : i64, tpu.core_type = #tpu.core_type<tc>, window_params = [{transform_indices = @transform_0, window_bounds = array<i64: 64, 4096>}, {transform_indices = @transform_1, window_bounds = array<i64: 64, 4096>}]} {
    %c0 = arith.constant 0 : index
    %c0_0 = arith.constant 0 : index
    %0 = vector.load %arg1[%c0, %c0_0] : memref<64x4096xf32, #tpu.memory_space<vmem>>, vector<64x4096xf32>
    %cst = arith.constant 2.500000e+00 : f32
    %1 = vector.broadcast %cst : f32 to vector<64x4096xf32>
    %2 = arith.mulf %1, %0 : vector<64x4096xf32>
    %3 = math.tanh %2 : vector<64x4096xf32>
    %4 = arith.mulf %0, %3 : vector<64x4096xf32>
    %5 = arith.minimumf %4, %0 : vector<64x4096xf32>
    %c0_1 = arith.constant 0 : index
    %c0_2 = arith.constant 0 : index
    %6 = vector.load %arg2[%c0_1, %c0_2] : memref<64x4096xf32, #tpu.memory_space<vmem>>, vector<64x4096xf32>
    tpu.vector_store %arg2[%c0_1, %c0_2], %5 {strides = array<i32>} : memref<64x4096xf32, #tpu.memory_space<vmem>>, vector<64x4096xf32>,
    return
  }
  func.func @transform_0(%arg0: i32) -> (i32, i32) {
    %c0_i32 = arith.constant 0 : i32
    %c0_i32_0 = arith.constant 0 : i32
    return %arg0, %c0_i32 : i32, i32
  }
  func.func @transform_1(%arg0: i32) -> (i32, i32) {
    %c0_i32 = arith.constant 0 : i32
    %c0_i32_0 = arith.constant 0 : i32
    return %arg0, %c0_i32 : i32, i32
  }
}

</mosaic_0001>

<bundles_post_ra>
// kernel: tpu_custom_call.1
= control target key start
LH: loop header
LB: loop body
LE: loop exit
PB: predicated region body
PF: predicated region fallthrough
CT: control target
= control target key end

     0   :  { %6 = vsyncpa [#allocation3], 0  ;;  %s4421_s0 = inlined_call_operand.hbm [shape: f32[128,4096], index: 0, kind: input, shape index: {}]   ;;  %s4422_s1 = inlined_call_operand.hbm [shape: f32[128,4096], index: 1, kind: output, shape index: {}]  }
   0x1   :  { %8 = vsyncpa [#allocation3 + $0x1], 0 }
   0x2   :  { %9 = vsyncpa [#allocation4], 0 }
   0x3   :  { %11 = vsyncpa [#allocation4 + $0x1], 0  ;;  %s2458_s6 = smov 0   ;;  %s2460_s7 = smov 0  }
   0x4   :  { %s2462_s8 = smov 0   ;;  %s2464_s9 = smov 0  }
   0x5 LB: > { %s2479_s10 = sadd.s32 4294967295, %s2440_s9   ;;  %s1762_s11 = sadd.s32 4294967294, %s2440_s9   ;;  %s2440_s9 = sphi %s2464_s9, %s4435_s9   ;;  %s2436_s8 = sphi %s2462_s8, %s4434_s8   ;;  %s2432_s7 = sphi %s2460_s7, %s4433_s7   ;;  %s2428_s6 = sphi %s2458_s6, %s4432_s6  }
   0x6   : > { %s2483_s12 = sadd.s32 1, %s2440_s9   ;;  %s24_s13 = sadd.s32 1, %s2436_s8 }
   0x7   : > { %s21_s14 = ssub.s32 %s2440_s9, %s2483_s12  ;;  %p31_p0 = scmp.ne.s32.totalorder %s2436_s8, %s2432_s7 }
   0x8   : > { %p22_p1 = scmp.eq.s32.totalorder %s21_s14, 0  ;;  %p32_p2 = scmp.eq.s32.totalorder %s2440_s9, 0 }
   0x9   : > { %p37_p3 = scmp.ne.s32.totalorder %s2432_s7, %s2428_s6  ;;  %p38_p4 = scmp.eq.s32.totalorder %s2479_s10, 0 }
   0xa   : > { %s2495_s15 = scalar_select %p22_p1, %s2436_s8, %s24_s13  }
   0xb   : > { %p2497_p5 = por %p32_p2, %p31_p0  ;;  %p2501_p6 = por %p38_p4, %p37_p3 }
   0xc   : > { %p61_p7 = scmp.eq.s32.totalorder %s2479_s10, 1  ;;  %p67_p8 = scmp.eq.s32.totalorder %s1762_s11, 1 }
   0xd   : > { %p1794_p10 = scmp.lt.s32.totalorder %s2440_s9, 2  ;;  %s87_s20 = sand.u32 1, %s2436_s8  }
   0xe   : > { %p2508_p11 = por %p61_p7, %p31_p0  ;;  %p2512_p12 = por %p67_p8, %p37_p3 }
   0xf   : > { %s1779_s21 = sshll.u32 %s2440_s9, 15  ;;  %s1765_s22 = sshll.u32 %s87_s20, 11 }
  0x10   : > { %s4426_s18 = scalar_select %p2508_p11, 1, 0 }
  0x11   : > { %s4427_s19 = scalar_select %p2512_p12, 1, 0 }
  0x12   : > { %s2521_s25 = scalar_lea.hbm %s4421_s0, %s1779_s21  ;;  %s91_s26 = scalar_lea.vmem [#allocation2], %s1765_s22 }
  0x13   : > { %s99_s27 = sshll.u32 %s91_s26, 4  ;;  %p2525_p13 = pnand %p1794_p10, %p2497_p5  ;;  %s2529_s27 = int_to_ptr.vmem [resolvable:$true] %s99_s27 }
  0x14   : > { %s2531_s29 = scalar_lea.sflag [#allocation3], %s87_s20  ;;  %s2344_s30 = scalar_lea.hbm %s2521_s25, 32768 }
  0x15   : > { %p2345_p0 = scmp.ne.s32.totalorder %s2521_s25, %s2344_s30  ;;  %p2346_p1 = pneg %p2525_p13 }
  0x16   : > { %s2349_s4 = scalar_lea.hbm %s4421_s0, 65536  ;;  %p2350_p4 = scmp.lt.u32.totalorder %s2521_s25, %s4421_s0 }
  0x17   : > { %p2347_p2 = pnand %p2346_p1, %p2345_p0  ;;  %p2351_p5 = scmp.lt.u32.totalorder %s2349_s4, %s2344_s30 }
  0x18   : > { %p2353_p8 = scmp.lt.u32.totalorder %s2344_s30, %s2521_s25 }
  0x19   : > { %p2348_p3 = pneg %p2347_p2  ;;  %p2352_p7 = por %p2351_p5, %p2350_p4 }
  0x1b   : > { %p2354_p10 = por %p2353_p8, %p2352_p7 }
  0x1d   : > { %p2355_p9 = pnand %p2354_p10, %p2348_p3 }
  0x1f   : > { %2358 = shalt.err (!%p2355_p9)
}
  0x20   : > { %s2359_s13 = scalar_lea.vmem %s2529_s27, 32768  ;;  %s2442_s14 = smov [#allocation2]  }
  0x21   : > { %p2360_p0 = scmp.ne.s32.totalorder %s2529_s27, %s2359_s13  ;;  %s2364_s16 = sshll.u32 %s2442_s14, 4  ;;  %s2365_s16 = int_to_ptr.vmem [resolvable:$false] %s2364_s16 }
  0x22   : > { %s2366_s20 = scalar_lea.vmem %s2365_s16, 65536  ;;  %p2367_p11 = scmp.lt.s32.totalorder %s2529_s27, %s2365_s16 }
  0x23   : > { %p2362_p2 = pnand %p2360_p0, %p2346_p1  ;;  %p2368_p4 = scmp.lt.s32.totalorder %s2366_s20, %s2359_s13 }
  0x25   : > { %p2363_p12 = pneg %p2362_p2  ;;  %p2369_p5 = por %p2368_p4, %p2367_p11 }
  0x27   : > { %p2370_p7 = pnand %p2369_p5, %p2363_p12 }
  0x29   : > { %2373 = shalt.err (!%p2370_p7)
}
  0x2a   : > { %s2443_s21 = smov 4096   ;;  %s2444_s22 = smov 256  }
  0x2b   : > { %1789 = dma.hbm_to_vmem [thread:$0]  (!%p2525_p13), %s2521_s25, 32768, %s2529_s27, %s2531_s29, %s2443_s21, %s2443_s21, %s2444_s22  }
  0x2c   : > { %p1769_p9 = scmp.ge.s32.totalorder %s2440_s9, 1  ;;  %p107_p1 = scmp.lt.s32.totalorder %s2440_s9, 3 }
  0x2e   : > { %p108_p3 = pnand %p1769_p9, %p107_p1 }
  0x2f   : > { %s2562_s23 = sand.u32 (!%p108_p3), 1, %s2432_s7  }
  0x30   : > { %111 = sbr.rel (%p108_p3) target bundleno = 344 (0x158), region = 24  ;;  %s1770_s24 = sshll.u32 (!%p108_p3), %s2562_s23, 11 }
  0x31   : > { %s114_s26 = scalar_lea.sflag (!%p108_p3), [#allocation3], %s2562_s23  ;;  %s2568_s30 = scalar_lea.vmem (!%p108_p3), [#allocation2], %s1770_s24 }
  0x37   : > { %2419 = dma.done.wait (%p2501_p6), %s114_s26, 32768  }
  0x38   : > { %2421 = vsyncadd (%p2501_p6), %s114_s26, 4294934528  ;;  %v2575_v0 = vld [vmem:[%s2568_s30] sm:$0xff]  ;;  %v2578_v1 = vld [vmem:[%s2568_s30 + $0x8] sm:$0xff]  ;;  %s2667_s17 = scalar_lea.vmem [#allocation5], %s1770_s24  ;;  %s1781_s25 = sshll.u32 %s2479_s10, 15 }
  0x39   : > { %v2581_v2 = vld [vmem:[%s2568_s30 + $0x10] sm:$0xff]  ;;  %v394_v3 = vmul.f32 2.5, %v2575_v0  ;;  %v395_v4 = vmul.f32 2.5, %v2578_v1  ;;  %v2587_v6 = vld [vmem:[%s2568_s30 + $0x18] sm:$0xff]  ;;  %v2590_v7 = vld [vmem:[%s2568_s30 + $0x20] sm:$0xff]  ;;  %s1689_s27 = sshll.u32 %s2667_s17, 4  ;;  %s4371_s29 = scalar_lea.hbm %s4422_s1, %s1781_s25  ;;  %s4373_s27 = int_to_ptr.vmem [resolvable:$true] %s1689_s27 }
  0x3a   : > { %v396_v5 = vmul.f32 2.5, %v2581_v2  ;;  %v2593_v8 = vld [vmem:[%s2568_s30 + $0x28] sm:$0xff]  ;;  %v397_v9 = vmul.f32 2.5, %v2587_v6  ;;  %v2597_v10 = vld [vmem:[%s2568_s30 + $0x30] sm:$0xff]  ;;  %v398_v11 = vmul.f32 2.5, %v2590_v7  ;;  %v2601_v12 = vld [vmem:[%s2568_s30 + $0x38] sm:$0xff] }
  0x3b   : > { %1832 = vtanh.f32 %v394_v3  ;;  %v399_v13 = vmul.f32 2.5, %v2593_v8  ;;  %v2605_v14 = vld [vmem:[%s2568_s30 + $0x40] sm:$0xff]  ;;  %v400_v15 = vmul.f32 2.5, %v2597_v10  ;;  %v2609_v16 = vld [vmem:[%s2568_s30 + $0x48] sm:$0xff]  ;;  %v401_v17 = vmul.f32 2.5, %v2601_v12  ;;  %v2613_v18 = vld [vmem:[%s2568_s30 + $0x50] sm:$0xff] }
  0x3c   : > { %1834 = vtanh.f32 %v395_v4  ;;  %v402_v19 = vmul.f32 2.5, %v2605_v14  ;;  %v2617_v20 = vld [vmem:[%s2568_s30 + $0x58] sm:$0xff]  ;;  %v403_v21 = vmul.f32 2.5, %v2609_v16  ;;  %v2621_v22 = vld [vmem:[%s2568_s30 + $0x60] sm:$0xff]  ;;  %v404_v23 = vmul.f32 2.5, %v2613_v18  ;;  %v2625_v24 = vld [vmem:[%s2568_s30 + $0x68] sm:$0xff] }
  0x3d   : > { %1836 = vtanh.f32 %v396_v5  ;;  %v405_v25 = vmul.f32 2.5, %v2617_v20  ;;  %v2629_v26 = vld [vmem:[%s2568_s30 + $0x70] sm:$0xff]  ;;  %v406_v27 = vmul.f32 2.5, %v2621_v22  ;;  %v2633_v28 = vld [vmem:[%s2568_s30 + $0x78] sm:$0xff]  ;;  %v407_v29 = vmul.f32 2.5, %v2625_v24  ;;  %v2637_v30 = vld [vmem:[%s2568_s30 + $0x80] sm:$0xff] }
  0x3e   : > { %1838 = vtanh.f32 %v397_v9  ;;  %v408_v32 = vmul.f32 2.5, %v2629_v26  ;;  %v2641_v33 = vld [vmem:[%s2568_s30 + $0x88] sm:$0xff]  ;;  %v409_v36 = vmul.f32 2.5, %v2633_v28  ;;  %v2646_v37 = vld [vmem:[%s2568_s30 + $0x90] sm:$0xff]  ;;  %v410_v40 = vmul.f32 2.5, %v2637_v30  ;;  %v2651_v41 = vld [vmem:[%s2568_s30 + $0x98] sm:$0xff] }
  0x3f   : > { %1840 = vtanh.f32 %v398_v11  ;;  %v411_v45 = vmul.f32 2.5, %v2641_v33  ;;  %v2657_v46 = vld [vmem:[%s2568_s30 + $0xa0] sm:$0xff]  ;;  %v412_v50 = vmul.f32 2.5, %v2646_v37  ;;  %v2663_v51 = vld [vmem:[%s2568_s30 + $0xa8] sm:$0xff]  ;;  %v413_v55 = vmul.f32 2.5, %v2651_v41  ;;  %v2674_v56 = vld [vmem:[%s2568_s30 + $0xb0] sm:$0xff] }
  0x40   : > { %1842 = vtanh.f32 %v399_v13  ;;  %v414_v60 = vmul.f32 2.5, %v2657_v46  ;;  %v2681_v61 = vld [vmem:[%s2568_s30 + $0xb8] sm:$0xff]  ;;  %s1675_s2 = scalar_lea.sflag [#allocation4], %s2562_s23  ;;  %s2374_s3 = scalar_lea.vmem %s4373_s27, 32768 }
  0x41   : > { %1844 = vtanh.f32 %v400_v15  ;;  %v417_v15 = vmul.f32 2.5, %v2681_v61  ;;  %p2375_p6 = scmp.ne.s32.totalorder %s4373_s27, %s2374_s3  ;;  %p4429_p11 = scmp.ne.s32.totalorder %s4426_s18, 0 }
  0x42   : > { %1846 = vtanh.f32 %v401_v17  ;;  %s2445_s4 = smov [#allocation5]  }
  0x43   : > { %1848 = vtanh.f32 %v402_v19  ;;  %p2376_p12 = pnand %p2375_p6, %p4429_p11  ;;  %s2378_s5 = sshll.u32 %s2445_s4, 4  ;;  %s2379_s5 = int_to_ptr.vmem [resolvable:$false] %s2378_s5 }
  0x44   : > { %1850 = vtanh.f32 %v403_v21  ;;  %s2380_s11 = scalar_lea.vmem %s2379_s5, 65536  ;;  %p2381_p8 = scmp.lt.s32.totalorder %s4373_s27, %s2379_s5 }
  0x45   : > { %v1833_v31 = vpop.eup %1832  ;;  %1852 = vtanh.f32 %v404_v23  ;;  %p2377_p13 = pneg %p2376_p12  ;;  %p2382_p10 = scmp.lt.s32.totalorder %s2380_s11, %s2374_s3 }
  0x46   : > { %v1835_v34 = vpop.eup %1834  ;;  %v906_v35 = vmul.f32 %v1833_v31, %v2575_v0  ;;  %1854 = vtanh.f32 %v405_v25 }
  0x47   : > { %v1837_v38 = vpop.eup %1836  ;;  %v907_v39 = vmul.f32 %v1835_v34, %v2578_v1  ;;  %1856 = vtanh.f32 %v406_v27  ;;  %p2383_p0 = por %p2382_p10, %p2381_p8 }
  0x48   : > { %v1839_v42 = vpop.eup %1838  ;;  %v1162_v43 = vmin.f32 %v906_v35, %v2575_v0  ;;  %v908_v44 = vmul.f32 %v1837_v38, %v2581_v2  ;;  %1858 = vtanh.f32 %v407_v29 }
  0x49   : > { %v1841_v47 = vpop.eup %1840  ;;  %v1163_v48 = vmin.f32 %v907_v39, %v2578_v1  ;;  %v909_v49 = vmul.f32 %v1839_v42, %v2587_v6  ;;  %1860 = vtanh.f32 %v408_v32  ;;  %v415_v1 = vmul.f32 2.5, %v2663_v51  ;;  %p2384_p2 = pnand %p2383_p0, %p2377_p13 }
  0x4a   : > { %v1843_v52 = vpop.eup %1842  ;;  %1418 = vst [vmem:[%s2667_s17] sm:$0xff] %v1162_v43  ;;  %v1164_v53 = vmin.f32 %v908_v44, %v2581_v2  ;;  %v910_v54 = vmul.f32 %v1841_v47, %v2590_v7  ;;  %1862 = vtanh.f32 %v409_v36  ;;  %v2688_v2 = vld [vmem:[%s2568_s30 + $0xc0] sm:$0xff] }
  0x4b   : > { %v1845_v57 = vpop.eup %1844  ;;  %1419 = vst [vmem:[%s2667_s17 + $0x8] sm:$0xff] %v1163_v48  ;;  %v1165_v58 = vmin.f32 %v909_v49, %v2587_v6  ;;  %v911_v59 = vmul.f32 %v1843_v52, %v2593_v8  ;;  %1864 = vtanh.f32 %v410_v40  ;;  %v416_v6 = vmul.f32 2.5, %v2674_v56 }
  0x4c   : > { %v1847_v62 = vpop.eup %1846  ;;  %1420 = vst [vmem:[%s2667_s17 + $0x10] sm:$0xff] %v1164_v53  ;;  %v1166_v63 = vmin.f32 %v910_v54, %v2590_v7  ;;  %v912_v0 = vmul.f32 %v1845_v57, %v2597_v10  ;;  %1866 = vtanh.f32 %v411_v45  ;;  %v2695_v7 = vld [vmem:[%s2568_s30 + $0xc8] sm:$0xff]  ;;  %v418_v23 = vmul.f32 2.5, %v2688_v2 }
  0x4d   : > { %v1849_v3 = vpop.eup %1848  ;;  %1421 = vst [vmem:[%s2667_s17 + $0x18] sm:$0xff] %v1165_v58  ;;  %v1167_v4 = vmin.f32 %v911_v59, %v2593_v8  ;;  %v913_v5 = vmul.f32 %v1847_v62, %v2601_v12  ;;  %1868 = vtanh.f32 %v412_v50  ;;  %v2702_v8 = vld [vmem:[%s2568_s30 + $0xd0] sm:$0xff]  ;;  %v419_v31 = vmul.f32 2.5, %v2695_v7 }
  0x4e   : > { %v1851_v9 = vpop.eup %1850  ;;  %1422 = vst [vmem:[%s2667_s17 + $0x20] sm:$0xff] %v1166_v63  ;;  %v1168_v11 = vmin.f32 %v912_v0, %v2597_v10  ;;  %v914_v13 = vmul.f32 %v1849_v3, %v2605_v14  ;;  %1870 = vtanh.f32 %v413_v55  ;;  %v2709_v10 = vld [vmem:[%s2568_s30 + $0xd8] sm:$0xff]  ;;  %v420_v36 = vmul.f32 2.5, %v2702_v8 }
  0x4f   : > { %v1853_v17 = vpop.eup %1852  ;;  %1423 = vst [vmem:[%s2667_s17 + $0x28] sm:$0xff] %v1167_v4  ;;  %v1169_v19 = vmin.f32 %v913_v5, %v2601_v12  ;;  %v915_v21 = vmul.f32 %v1851_v9, %v2609_v16  ;;  %1872 = vtanh.f32 %v414_v60  ;;  %v2716_v12 = vld [vmem:[%s2568_s30 + $0xe0] sm:$0xff]  ;;  %v421_v42 = vmul.f32 2.5, %v2709_v10 }
  0x50   : > { %v1855_v25 = vpop.eup %1854  ;;  %1424 = vst [vmem:[%s2667_s17 + $0x30] sm:$0xff] %v1168_v11  ;;  %v1170_v27 = vmin.f32 %v914_v13, %v2605_v14  ;;  %v916_v29 = vmul.f32 %v1853_v17, %v2613_v18  ;;  %1874 = vtanh.f32 %v415_v1  ;;  %v2723_v14 = vld [vmem:[%s2568_s30 + $0xe8] sm:$0xff]  ;;  %v422_v47 = vmul.f32 2.5, %v2716_v12 }
  0x51   : > { %v1857_v32 = vpop.eup %1856  ;;  %1425 = vst [vmem:[%s2667_s17 + $0x38] sm:$0xff] %v1169_v19  ;;  %v1171_v34 = vmin.f32 %v915_v21, %v2609_v16  ;;  %v917_v35 = vmul.f32 %v1855_v25, %v2617_v20  ;;  %1876 = vtanh.f32 %v416_v6  ;;  %v2730_v16 = vld [vmem:[%s2568_s30 + $0xf0] sm:$0xff]  ;;  %v423_v52 = vmul.f32 2.5, %v2723_v14 }
  0x52   : > { %v1859_v38 = vpop.eup %1858  ;;  %1426 = vst [vmem:[%s2667_s17 + $0x40] sm:$0xff] %v1170_v27  ;;  %v1172_v39 = vmin.f32 %v916_v29, %v2613_v18  ;;  %v918_v40 = vmul.f32 %v1857_v32, %v2621_v22  ;;  %1878 = vtanh.f32 %v417_v15  ;;  %v2737_v18 = vld [vmem:[%s2568_s30 + $0xf8] sm:$0xff]  ;;  %v424_v57 = vmul.f32 2.5, %v2730_v16 }
  0x53   : > { %v1861_v43 = vpop.eup %1860  ;;  %1427 = vst [vmem:[%s2667_s17 + $0x48] sm:$0xff] %v1171_v34  ;;  %v1173_v44 = vmin.f32 %v917_v35, %v2617_v20  ;;  %v919_v45 = vmul.f32 %v1859_v38, %v2625_v24  ;;  %1880 = vtanh.f32 %v418_v23  ;;  %v2744_v20 = vld [vmem:[%s2568_s30 + $0x100] sm:$0xff]  ;;  %v425_v62 = vmul.f32 2.5, %v2737_v18 }
  0x54   : > { %v1863_v48 = vpop.eup %1862  ;;  %1428 = vst [vmem:[%s2667_s17 + $0x50] sm:$0xff] %v1172_v39  ;;  %v1174_v49 = vmin.f32 %v918_v40, %v2621_v22  ;;  %v920_v50 = vmul.f32 %v1861_v43, %v2629_v26  ;;  %1882 = vtanh.f32 %v419_v31  ;;  %v2751_v22 = vld [vmem:[%s2568_s30 + $0x108] sm:$0xff]  ;;  %v426_v3 = vmul.f32 2.5, %v2744_v20 }
  0x55   : > { %v1865_v53 = vpop.eup %1864  ;;  %1429 = vst [vmem:[%s2667_s17 + $0x58] sm:$0xff] %v1173_v44  ;;  %v1175_v54 = vmin.f32 %v919_v45, %v2625_v24  ;;  %v921_v55 = vmul.f32 %v1863_v48, %v2633_v28  ;;  %1884 = vtanh.f32 %v420_v36  ;;  %v2758_v24 = vld [vmem:[%s2568_s30 + $0x110] sm:$0xff]  ;;  %v427_v9 = vmul.f32 2.5, %v2751_v22 }
  0x56   : > { %v1867_v58 = vpop.eup %1866  ;;  %1430 = vst [vmem:[%s2667_s17 + $0x60] sm:$0xff] %v1174_v49  ;;  %v1176_v59 = vmin.f32 %v920_v50, %v2629_v26  ;;  %v922_v60 = vmul.f32 %v1865_v53, %v2637_v30  ;;  %1886 = vtanh.f32 %v421_v42  ;;  %v2765_v26 = vld [vmem:[%s2568_s30 + $0x118] sm:$0xff]  ;;  %v428_v17 = vmul.f32 2.5, %v2758_v24 }
  0x57   : > { %v1869_v63 = vpop.eup %1868  ;;  %1431 = vst [vmem:[%s2667_s17 + $0x68] sm:$0xff] %v1175_v54  ;;  %v1177_v0 = vmin.f32 %v921_v55, %v2633_v28  ;;  %v923_v1 = vmul.f32 %v1867_v58, %v2641_v33  ;;  %1888 = vtanh.f32 %v422_v47  ;;  %v2772_v28 = vld [vmem:[%s2568_s30 + $0x120] sm:$0xff]  ;;  %v429_v25 = vmul.f32 2.5, %v2765_v26 }
  0x58   : > { %v1871_v4 = vpop.eup %1870  ;;  %1432 = vst [vmem:[%s2667_s17 + $0x70] sm:$0xff] %v1176_v59  ;;  %v1178_v5 = vmin.f32 %v922_v60, %v2637_v30  ;;  %v924_v6 = vmul.f32 %v1869_v63, %v2646_v37  ;;  %1890 = vtanh.f32 %v423_v52  ;;  %v2779_v30 = vld [vmem:[%s2568_s30 + $0x128] sm:$0xff]  ;;  %v430_v32 = vmul.f32 2.5, %v2772_v28 }
  0x59   : > { %v1873_v11 = vpop.eup %1872  ;;  %1433 = vst [vmem:[%s2667_s17 + $0x78] sm:$0xff] %v1177_v0  ;;  %v1179_v13 = vmin.f32 %v923_v1, %v2641_v33  ;;  %v925_v15 = vmul.f32 %v1871_v4, %v2651_v41  ;;  %1892 = vtanh.f32 %v424_v57  ;;  %v2786_v33 = vld [vmem:[%s2568_s30 + $0x130] sm:$0xff]  ;;  %v431_v38 = vmul.f32 2.5, %v2779_v30 }
  0x5a   : > { %v1875_v19 = vpop.eup %1874  ;;  %1434 = vst [vmem:[%s2667_s17 + $0x80] sm:$0xff] %v1178_v5  ;;  %v1180_v21 = vmin.f32 %v924_v6, %v2646_v37  ;;  %v926_v23 = vmul.f32 %v1873_v11, %v2657_v46  ;;  %1894 = vtanh.f32 %v425_v62  ;;  %v2793_v37 = vld [vmem:[%s2568_s30 + $0x138] sm:$0xff]  ;;  %v432_v43 = vmul.f32 2.5, %v2786_v33 }
  0x5b   : > { %v1877_v27 = vpop.eup %1876  ;;  %1435 = vst [vmem:[%s2667_s17 + $0x88] sm:$0xff] %v1179_v13  ;;  %v1181_v29 = vmin.f32 %v925_v15, %v2651_v41  ;;  %v927_v31 = vmul.f32 %v1875_v19, %v2663_v51  ;;  %1896 = vtanh.f32 %v426_v3  ;;  %v2800_v41 = vld [vmem:[%s2568_s30 + $0x140] sm:$0xff]  ;;  %v433_v48 = vmul.f32 2.5, %v2793_v37 }
  0x5c   : > { %v1879_v34 = vpop.eup %1878  ;;  %1436 = vst [vmem:[%s2667_s17 + $0x90] sm:$0xff] %v1180_v21  ;;  %v1182_v35 = vmin.f32 %v926_v23, %v2657_v46  ;;  %v928_v36 = vmul.f32 %v1877_v27, %v2674_v56  ;;  %1898 = vtanh.f32 %v427_v9  ;;  %v2807_v46 = vld [vmem:[%s2568_s30 + $0x148] sm:$0xff]  ;;  %v434_v53 = vmul.f32 2.5, %v2800_v41 }
  0x5d   : > { %v1881_v39 = vpop.eup %1880  ;;  %1437 = vst [vmem:[%s2667_s17 + $0x98] sm:$0xff] %v1181_v29  ;;  %v1183_v40 = vmin.f32 %v927_v31, %v2663_v51  ;;  %v929_v42 = vmul.f32 %v1879_v34, %v2681_v61  ;;  %1900 = vtanh.f32 %v428_v17  ;;  %v2814_v51 = vld [vmem:[%s2568_s30 + $0x150] sm:$0xff]  ;;  %v435_v58 = vmul.f32 2.5, %v2807_v46 }
  0x5e   : > { %v1883_v44 = vpop.eup %1882  ;;  %1438 = vst [vmem:[%s2667_s17 + $0xa0] sm:$0xff] %v1182_v35  ;;  %v1184_v45 = vmin.f32 %v928_v36, %v2674_v56  ;;  %v930_v47 = vmul.f32 %v1881_v39, %v2688_v2  ;;  %1902 = vtanh.f32 %v429_v25  ;;  %v2821_v56 = vld [vmem:[%s2568_s30 + $0x158] sm:$0xff]  ;;  %v436_v63 = vmul.f32 2.5, %v2814_v51 }
  0x5f   : > { %v1885_v49 = vpop.eup %1884  ;;  %1439 = vst [vmem:[%s2667_s17 + $0xa8] sm:$0xff] %v1183_v40  ;;  %v1185_v50 = vmin.f32 %v929_v42, %v2681_v61  ;;  %v931_v52 = vmul.f32 %v1883_v44, %v2695_v7  ;;  %1904 = vtanh.f32 %v430_v32  ;;  %v2828_v61 = vld [vmem:[%s2568_s30 + $0x160] sm:$0xff]  ;;  %v437_v4 = vmul.f32 2.5, %v2821_v56 }
  0x60   : > { %v1887_v54 = vpop.eup %1886  ;;  %1440 = vst [vmem:[%s2667_s17 + $0xb0] sm:$0xff] %v1184_v45  ;;  %v1186_v55 = vmin.f32 %v930_v47, %v2688_v2  ;;  %v932_v57 = vmul.f32 %v1885_v49, %v2702_v8  ;;  %1906 = vtanh.f32 %v431_v38  ;;  %v2835_v2 = vld [vmem:[%s2568_s30 + $0x168] sm:$0xff]  ;;  %v438_v11 = vmul.f32 2.5, %v2828_v61 }
  0x61   : > { %v1889_v59 = vpop.eup %1888  ;;  %1441 = vst [vmem:[%s2667_s17 + $0xb8] sm:$0xff] %v1185_v50  ;;  %v1187_v60 = vmin.f32 %v931_v52, %v2695_v7  ;;  %v933_v62 = vmul.f32 %v1887_v54, %v2709_v10  ;;  %1908 = vtanh.f32 %v432_v43  ;;  %v2842_v7 = vld [vmem:[%s2568_s30 + $0x170] sm:$0xff]  ;;  %v439_v19 = vmul.f32 2.5, %v2835_v2 }
  0x62   : > { %v1891_v0 = vpop.eup %1890  ;;  %1442 = vst [vmem:[%s2667_s17 + $0xc0] sm:$0xff] %v1186_v55  ;;  %v1188_v1 = vmin.f32 %v932_v57, %v2702_v8  ;;  %v934_v3 = vmul.f32 %v1889_v59, %v2716_v12  ;;  %1910 = vtanh.f32 %v433_v48  ;;  %v2849_v8 = vld [vmem:[%s2568_s30 + $0x178] sm:$0xff]  ;;  %v440_v27 = vmul.f32 2.5, %v2842_v7 }
  0x63   : > { %v1893_v5 = vpop.eup %1892  ;;  %1443 = vst [vmem:[%s2667_s17 + $0xc8] sm:$0xff] %v1187_v60  ;;  %v1189_v6 = vmin.f32 %v933_v62, %v2709_v10  ;;  %v935_v9 = vmul.f32 %v1891_v0, %v2723_v14  ;;  %1912 = vtanh.f32 %v434_v53  ;;  %v2856_v10 = vld [vmem:[%s2568_s30 + $0x180] sm:$0xff]  ;;  %v441_v34 = vmul.f32 2.5, %v2849_v8 }
  0x64   : > { %v1895_v13 = vpop.eup %1894  ;;  %1444 = vst [vmem:[%s2667_s17 + $0xd0] sm:$0xff] %v1188_v1  ;;  %v1190_v15 = vmin.f32 %v934_v3, %v2716_v12  ;;  %v936_v17 = vmul.f32 %v1893_v5, %v2730_v16  ;;  %1914 = vtanh.f32 %v435_v58  ;;  %v2863_v12 = vld [vmem:[%s2568_s30 + $0x188] sm:$0xff]  ;;  %v442_v39 = vmul.f32 2.5, %v2856_v10 }
  0x65   : > { %v1897_v21 = vpop.eup %1896  ;;  %1445 = vst [vmem:[%s2667_s17 + $0xd8] sm:$0xff] %v1189_v6  ;;  %v1191_v23 = vmin.f32 %v935_v9, %v2723_v14  ;;  %v937_v25 = vmul.f32 %v1895_v13, %v2737_v18  ;;  %1916 = vtanh.f32 %v436_v63  ;;  %v2870_v14 = vld [vmem:[%s2568_s30 + $0x190] sm:$0xff]  ;;  %v443_v44 = vmul.f32 2.5, %v2863_v12 }
  0x66   : > { %v1899_v29 = vpop.eup %1898  ;;  %1446 = vst [vmem:[%s2667_s17 + $0xe0] sm:$0xff] %v1190_v15  ;;  %v1192_v31 = vmin.f32 %v936_v17, %v2730_v16  ;;  %v938_v32 = vmul.f32 %v1897_v21, %v2744_v20  ;;  %1918 = vtanh.f32 %v437_v4  ;;  %v2877_v16 = vld [vmem:[%s2568_s30 + $0x198] sm:$0xff]  ;;  %v444_v49 = vmul.f32 2.5, %v2870_v14 }
  0x67   : > { %v1901_v35 = vpop.eup %1900  ;;  %1447 = vst [vmem:[%s2667_s17 + $0xe8] sm:$0xff] %v1191_v23  ;;  %v1193_v36 = vmin.f32 %v937_v25, %v2737_v18  ;;  %v939_v38 = vmul.f32 %v1899_v29, %v2751_v22  ;;  %1920 = vtanh.f32 %v438_v11  ;;  %v2884_v18 = vld [vmem:[%s2568_s30 + $0x1a0] sm:$0xff]  ;;  %v445_v54 = vmul.f32 2.5, %v2877_v16 }
  0x68   : > { %v1903_v40 = vpop.eup %1902  ;;  %1448 = vst [vmem:[%s2667_s17 + $0xf0] sm:$0xff] %v1192_v31  ;;  %v1194_v42 = vmin.f32 %v938_v32, %v2744_v20  ;;  %v940_v43 = vmul.f32 %v1901_v35, %v2758_v24  ;;  %1922 = vtanh.f32 %v439_v19  ;;  %v2891_v20 = vld [vmem:[%s2568_s30 + $0x1a8] sm:$0xff]  ;;  %v446_v59 = vmul.f32 2.5, %v2884_v18 }
  0x69   : > { %v1905_v45 = vpop.eup %1904  ;;  %1449 = vst [vmem:[%s2667_s17 + $0xf8] sm:$0xff] %v1193_v36  ;;  %v1195_v47 = vmin.f32 %v939_v38, %v2751_v22  ;;  %v941_v48 = vmul.f32 %v1903_v40, %v2765_v26  ;;  %1924 = vtanh.f32 %v440_v27  ;;  %v2898_v22 = vld [vmem:[%s2568_s30 + $0x1b0] sm:$0xff]  ;;  %v447_v0 = vmul.f32 2.5, %v2891_v20 }
  0x6a   : > { %v1907_v50 = vpop.eup %1906  ;;  %1450 = vst [vmem:[%s2667_s17 + $0x100] sm:$0xff] %v1194_v42  ;;  %v1196_v52 = vmin.f32 %v940_v43, %v2758_v24  ;;  %v942_v53 = vmul.f32 %v1905_v45, %v2772_v28  ;;  %1926 = vtanh.f32 %v441_v34  ;;  %v2905_v24 = vld [vmem:[%s2568_s30 + $0x1b8] sm:$0xff]  ;;  %v448_v5 = vmul.f32 2.5, %v2898_v22 }
  0x6b   : > { %v1909_v55 = vpop.eup %1908  ;;  %1451 = vst [vmem:[%s2667_s17 + $0x108] sm:$0xff] %v1195_v47  ;;  %v1197_v57 = vmin.f32 %v941_v48, %v2765_v26  ;;  %v943_v58 = vmul.f32 %v1907_v50, %v2779_v30  ;;  %1928 = vtanh.f32 %v442_v39  ;;  %v2912_v26 = vld [vmem:[%s2568_s30 + $0x1c0] sm:$0xff]  ;;  %v449_v13 = vmul.f32 2.5, %v2905_v24 }
  0x6c   : > { %v1911_v60 = vpop.eup %1910  ;;  %1452 = vst [vmem:[%s2667_s17 + $0x110] sm:$0xff] %v1196_v52  ;;  %v1198_v62 = vmin.f32 %v942_v53, %v2772_v28  ;;  %v944_v63 = vmul.f32 %v1909_v55, %v2786_v33  ;;  %1930 = vtanh.f32 %v443_v44  ;;  %v2919_v28 = vld [vmem:[%s2568_s30 + $0x1c8] sm:$0xff]  ;;  %v450_v21 = vmul.f32 2.5, %v2912_v26 }
  0x6d   : > { %v1913_v1 = vpop.eup %1912  ;;  %1453 = vst [vmem:[%s2667_s17 + $0x118] sm:$0xff] %v1197_v57  ;;  %v1199_v3 = vmin.f32 %v943_v58, %v2779_v30  ;;  %v945_v4 = vmul.f32 %v1911_v60, %v2793_v37  ;;  %1932 = vtanh.f32 %v444_v49  ;;  %v2926_v30 = vld [vmem:[%s2568_s30 + $0x1d0] sm:$0xff]  ;;  %v451_v29 = vmul.f32 2.5, %v2919_v28 }
  0x6e   : > { %v1915_v6 = vpop.eup %1914  ;;  %1454 = vst [vmem:[%s2667_s17 + $0x120] sm:$0xff] %v1198_v62  ;;  %v1200_v9 = vmin.f32 %v944_v63, %v2786_v33  ;;  %v946_v11 = vmul.f32 %v1913_v1, %v2800_v41  ;;  %1934 = vtanh.f32 %v445_v54  ;;  %v2933_v33 = vld [vmem:[%s2568_s30 + $0x1d8] sm:$0xff]  ;;  %v452_v35 = vmul.f32 2.5, %v2926_v30 }
  0x6f   : > { %v1917_v15 = vpop.eup %1916  ;;  %1455 = vst [vmem:[%s2667_s17 + $0x128] sm:$0xff] %v1199_v3  ;;  %v1201_v17 = vmin.f32 %v945_v4, %v2793_v37  ;;  %v947_v19 = vmul.f32 %v1915_v6, %v2807_v46  ;;  %1936 = vtanh.f32 %v446_v59  ;;  %v2940_v37 = vld [vmem:[%s2568_s30 + $0x1e0] sm:$0xff]  ;;  %v453_v40 = vmul.f32 2.5, %v2933_v33 }
  0x70   : > { %v1919_v23 = vpop.eup %1918  ;;  %1456 = vst [vmem:[%s2667_s17 + $0x130] sm:$0xff] %v1200_v9  ;;  %v1202_v25 = vmin.f32 %v946_v11, %v2800_v41  ;;  %v948_v27 = vmul.f32 %v1917_v15, %v2814_v51  ;;  %1938 = vtanh.f32 %v447_v0  ;;  %v2947_v41 = vld [vmem:[%s2568_s30 + $0x1e8] sm:$0xff]  ;;  %v454_v45 = vmul.f32 2.5, %v2940_v37 }
  0x71   : > { %v1921_v31 = vpop.eup %1920  ;;  %1457 = vst [vmem:[%s2667_s17 + $0x138] sm:$0xff] %v1201_v17  ;;  %v1203_v32 = vmin.f32 %v947_v19, %v2807_v46  ;;  %v949_v34 = vmul.f32 %v1919_v23, %v2821_v56  ;;  %1940 = vtanh.f32 %v448_v5  ;;  %v2954_v46 = vld [vmem:[%s2568_s30 + $0x1f0] sm:$0xff]  ;;  %v455_v50 = vmul.f32 2.5, %v2947_v41 }
  0x72   : > { %v1923_v36 = vpop.eup %1922  ;;  %1458 = vst [vmem:[%s2667_s17 + $0x140] sm:$0xff] %v1202_v25  ;;  %v1204_v38 = vmin.f32 %v948_v27, %v2814_v51  ;;  %v950_v39 = vmul.f32 %v1921_v31, %v2828_v61  ;;  %1942 = vtanh.f32 %v449_v13  ;;  %v2961_v51 = vld [vmem:[%s2568_s30 + $0x1f8] sm:$0xff]  ;;  %v456_v55 = vmul.f32 2.5, %v2954_v46 }
  0x73   : > { %v1925_v42 = vpop.eup %1924  ;;  %1459 = vst [vmem:[%s2667_s17 + $0x148] sm:$0xff] %v1203_v32  ;;  %v1205_v43 = vmin.f32 %v949_v34, %v2821_v56  ;;  %v951_v44 = vmul.f32 %v1923_v36, %v2835_v2  ;;  %1944 = vtanh.f32 %v450_v21  ;;  %v2968_v56 = vld [vmem:[%s2568_s30 + $0x200] sm:$0xff]  ;;  %v457_v60 = vmul.f32 2.5, %v2961_v51 }
  0x74   : > { %v1927_v47 = vpop.eup %1926  ;;  %1460 = vst [vmem:[%s2667_s17 + $0x150] sm:$0xff] %v1204_v38  ;;  %v1206_v48 = vmin.f32 %v950_v39, %v2828_v61  ;;  %v952_v49 = vmul.f32 %v1925_v42, %v2842_v7  ;;  %1946 = vtanh.f32 %v451_v29  ;;  %v2975_v61 = vld [vmem:[%s2568_s30 + $0x208] sm:$0xff]  ;;  %v458_v1 = vmul.f32 2.5, %v2968_v56 }
  0x75   : > { %v1929_v52 = vpop.eup %1928  ;;  %1461 = vst [vmem:[%s2667_s17 + $0x158] sm:$0xff] %v1205_v43  ;;  %v1207_v53 = vmin.f32 %v951_v44, %v2835_v2  ;;  %v953_v54 = vmul.f32 %v1927_v47, %v2849_v8  ;;  %1948 = vtanh.f32 %v452_v35  ;;  %v2982_v2 = vld [vmem:[%s2568_s30 + $0x210] sm:$0xff]  ;;  %v459_v6 = vmul.f32 2.5, %v2975_v61 }
  0x76   : > { %v1931_v57 = vpop.eup %1930  ;;  %1462 = vst [vmem:[%s2667_s17 + $0x160] sm:$0xff] %v1206_v48  ;;  %v1208_v58 = vmin.f32 %v952_v49, %v2842_v7  ;;  %v954_v59 = vmul.f32 %v1929_v52, %v2856_v10  ;;  %1950 = vtanh.f32 %v453_v40  ;;  %v2989_v7 = vld [vmem:[%s2568_s30 + $0x218] sm:$0xff]  ;;  %v460_v15 = vmul.f32 2.5, %v2982_v2 }
  0x77   : > { %v1933_v62 = vpop.eup %1932  ;;  %1463 = vst [vmem:[%s2667_s17 + $0x168] sm:$0xff] %v1207_v53  ;;  %v1209_v63 = vmin.f32 %v953_v54, %v2849_v8  ;;  %v955_v0 = vmul.f32 %v1931_v57, %v2863_v12  ;;  %1952 = vtanh.f32 %v454_v45  ;;  %v2996_v8 = vld [vmem:[%s2568_s30 + $0x220] sm:$0xff]  ;;  %v461_v23 = vmul.f32 2.5, %v2989_v7 }
  0x78   : > { %v1935_v3 = vpop.eup %1934  ;;  %1464 = vst [vmem:[%s2667_s17 + $0x170] sm:$0xff] %v1208_v58  ;;  %v1210_v4 = vmin.f32 %v954_v59, %v2856_v10  ;;  %v956_v5 = vmul.f32 %v1933_v62, %v2870_v14  ;;  %1954 = vtanh.f32 %v455_v50  ;;  %v3003_v10 = vld [vmem:[%s2568_s30 + $0x228] sm:$0xff]  ;;  %v462_v31 = vmul.f32 2.5, %v2996_v8 }
  0x79   : > { %v1937_v9 = vpop.eup %1936  ;;  %1465 = vst [vmem:[%s2667_s17 + $0x178] sm:$0xff] %v1209_v63  ;;  %v1211_v11 = vmin.f32 %v955_v0, %v2863_v12  ;;  %v957_v13 = vmul.f32 %v1935_v3, %v2877_v16  ;;  %1956 = vtanh.f32 %v456_v55  ;;  %v3010_v12 = vld [vmem:[%s2568_s30 + $0x230] sm:$0xff]  ;;  %v463_v36 = vmul.f32 2.5, %v3003_v10 }
  0x7a   : > { %v1939_v17 = vpop.eup %1938  ;;  %1466 = vst [vmem:[%s2667_s17 + $0x180] sm:$0xff] %v1210_v4  ;;  %v1212_v19 = vmin.f32 %v956_v5, %v2870_v14  ;;  %v958_v21 = vmul.f32 %v1937_v9, %v2884_v18  ;;  %1958 = vtanh.f32 %v457_v60  ;;  %v3017_v14 = vld [vmem:[%s2568_s30 + $0x238] sm:$0xff]  ;;  %v464_v42 = vmul.f32 2.5, %v3010_v12 }
  0x7b   : > { %v1941_v25 = vpop.eup %1940  ;;  %1467 = vst [vmem:[%s2667_s17 + $0x188] sm:$0xff] %v1211_v11  ;;  %v1213_v27 = vmin.f32 %v957_v13, %v2877_v16  ;;  %v959_v29 = vmul.f32 %v1939_v17, %v2891_v20  ;;  %1960 = vtanh.f32 %v458_v1  ;;  %v3024_v16 = vld [vmem:[%s2568_s30 + $0x240] sm:$0xff]  ;;  %v465_v47 = vmul.f32 2.5, %v3017_v14 }
  0x7c   : > { %v1943_v32 = vpop.eup %1942  ;;  %1468 = vst [vmem:[%s2667_s17 + $0x190] sm:$0xff] %v1212_v19  ;;  %v1214_v34 = vmin.f32 %v958_v21, %v2884_v18  ;;  %v960_v35 = vmul.f32 %v1941_v25, %v2898_v22  ;;  %1962 = vtanh.f32 %v459_v6  ;;  %v3031_v18 = vld [vmem:[%s2568_s30 + $0x248] sm:$0xff]  ;;  %v466_v52 = vmul.f32 2.5, %v3024_v16 }
  0x7d   : > { %v1945_v38 = vpop.eup %1944  ;;  %1469 = vst [vmem:[%s2667_s17 + $0x198] sm:$0xff] %v1213_v27  ;;  %v1215_v39 = vmin.f32 %v959_v29, %v2891_v20  ;;  %v961_v40 = vmul.f32 %v1943_v32, %v2905_v24  ;;  %1964 = vtanh.f32 %v460_v15  ;;  %v3038_v20 = vld [vmem:[%s2568_s30 + $0x250] sm:$0xff]  ;;  %v467_v57 = vmul.f32 2.5, %v3031_v18 }
  0x7e   : > { %v1947_v43 = vpop.eup %1946  ;;  %1470 = vst [vmem:[%s2667_s17 + $0x1a0] sm:$0xff] %v1214_v34  ;;  %v1216_v44 = vmin.f32 %v960_v35, %v2898_v22  ;;  %v962_v45 = vmul.f32 %v1945_v38, %v2912_v26  ;;  %1966 = vtanh.f32 %v461_v23  ;;  %v3045_v22 = vld [vmem:[%s2568_s30 + $0x258] sm:$0xff]  ;;  %v468_v62 = vmul.f32 2.5, %v3038_v20 }
  0x7f   : > { %v1949_v48 = vpop.eup %1948  ;;  %1471 = vst [vmem:[%s2667_s17 + $0x1a8] sm:$0xff] %v1215_v39  ;;  %v1217_v49 = vmin.f32 %v961_v40, %v2905_v24  ;;  %v963_v50 = vmul.f32 %v1947_v43, %v2919_v28  ;;  %1968 = vtanh.f32 %v462_v31  ;;  %v3052_v24 = vld [vmem:[%s2568_s30 + $0x260] sm:$0xff]  ;;  %v469_v3 = vmul.f32 2.5, %v3045_v22 }
  0x80   : > { %v1951_v53 = vpop.eup %1950  ;;  %1472 = vst [vmem:[%s2667_s17 + $0x1b0] sm:$0xff] %v1216_v44  ;;  %v1218_v54 = vmin.f32 %v962_v45, %v2912_v26  ;;  %v964_v55 = vmul.f32 %v1949_v48, %v2926_v30  ;;  %1970 = vtanh.f32 %v463_v36  ;;  %v3059_v26 = vld [vmem:[%s2568_s30 + $0x268] sm:$0xff]  ;;  %v470_v9 = vmul.f32 2.5, %v3052_v24 }
  0x81   : > { %v1953_v58 = vpop.eup %1952  ;;  %1473 = vst [vmem:[%s2667_s17 + $0x1b8] sm:$0xff] %v1217_v49  ;;  %v1219_v59 = vmin.f32 %v963_v50, %v2919_v28  ;;  %v965_v60 = vmul.f32 %v1951_v53, %v2933_v33  ;;  %1972 = vtanh.f32 %v464_v42  ;;  %v3066_v28 = vld [vmem:[%s2568_s30 + $0x270] sm:$0xff]  ;;  %v471_v17 = vmul.f32 2.5, %v3059_v26 }
  0x82   : > { %v1955_v63 = vpop.eup %1954  ;;  %1474 = vst [vmem:[%s2667_s17 + $0x1c0] sm:$0xff] %v1218_v54  ;;  %v1220_v0 = vmin.f32 %v964_v55, %v2926_v30  ;;  %v966_v1 = vmul.f32 %v1953_v58, %v2940_v37  ;;  %1974 = vtanh.f32 %v465_v47  ;;  %v3073_v30 = vld [vmem:[%s2568_s30 + $0x278] sm:$0xff]  ;;  %v472_v25 = vmul.f32 2.5, %v3066_v28 }
  0x83   : > { %v1957_v4 = vpop.eup %1956  ;;  %1475 = vst [vmem:[%s2667_s17 + $0x1c8] sm:$0xff] %v1219_v59  ;;  %v1221_v5 = vmin.f32 %v965_v60, %v2933_v33  ;;  %v967_v6 = vmul.f32 %v1955_v63, %v2947_v41  ;;  %1976 = vtanh.f32 %v466_v52  ;;  %v3080_v33 = vld [vmem:[%s2568_s30 + $0x280] sm:$0xff]  ;;  %v473_v32 = vmul.f32 2.5, %v3073_v30 }
  0x84   : > { %v1959_v11 = vpop.eup %1958  ;;  %1476 = vst [vmem:[%s2667_s17 + $0x1d0] sm:$0xff] %v1220_v0  ;;  %v1222_v13 = vmin.f32 %v966_v1, %v2940_v37  ;;  %v968_v15 = vmul.f32 %v1957_v4, %v2954_v46  ;;  %1978 = vtanh.f32 %v467_v57  ;;  %v3087_v37 = vld [vmem:[%s2568_s30 + $0x288] sm:$0xff]  ;;  %v474_v38 = vmul.f32 2.5, %v3080_v33 }
  0x85   : > { %v1961_v19 = vpop.eup %1960  ;;  %1477 = vst [vmem:[%s2667_s17 + $0x1d8] sm:$0xff] %v1221_v5  ;;  %v1223_v21 = vmin.f32 %v967_v6, %v2947_v41  ;;  %v969_v23 = vmul.f32 %v1959_v11, %v2961_v51  ;;  %1980 = vtanh.f32 %v468_v62  ;;  %v3094_v41 = vld [vmem:[%s2568_s30 + $0x290] sm:$0xff]  ;;  %v475_v43 = vmul.f32 2.5, %v3087_v37 }
  0x86   : > { %v1963_v27 = vpop.eup %1962  ;;  %1478 = vst [vmem:[%s2667_s17 + $0x1e0] sm:$0xff] %v1222_v13  ;;  %v1224_v29 = vmin.f32 %v968_v15, %v2954_v46  ;;  %v970_v31 = vmul.f32 %v1961_v19, %v2968_v56  ;;  %1982 = vtanh.f32 %v469_v3  ;;  %v3101_v46 = vld [vmem:[%s2568_s30 + $0x298] sm:$0xff]  ;;  %v476_v48 = vmul.f32 2.5, %v3094_v41 }
  0x87   : > { %v1965_v34 = vpop.eup %1964  ;;  %1479 = vst [vmem:[%s2667_s17 + $0x1e8] sm:$0xff] %v1223_v21  ;;  %v1225_v35 = vmin.f32 %v969_v23, %v2961_v51  ;;  %v971_v36 = vmul.f32 %v1963_v27, %v2975_v61  ;;  %1984 = vtanh.f32 %v470_v9  ;;  %v3108_v51 = vld [vmem:[%s2568_s30 + $0x2a0] sm:$0xff]  ;;  %v477_v53 = vmul.f32 2.5, %v3101_v46 }
  0x88   : > { %v1967_v39 = vpop.eup %1966  ;;  %1480 = vst [vmem:[%s2667_s17 + $0x1f0] sm:$0xff] %v1224_v29  ;;  %v1226_v40 = vmin.f32 %v970_v31, %v2968_v56  ;;  %v972_v42 = vmul.f32 %v1965_v34, %v2982_v2  ;;  %1986 = vtanh.f32 %v471_v17  ;;  %v3115_v56 = vld [vmem:[%s2568_s30 + $0x2a8] sm:$0xff]  ;;  %v478_v58 = vmul.f32 2.5, %v3108_v51 }
  0x89   : > { %v1969_v44 = vpop.eup %1968  ;;  %1481 = vst [vmem:[%s2667_s17 + $0x1f8] sm:$0xff] %v1225_v35  ;;  %v1227_v45 = vmin.f32 %v971_v36, %v2975_v61  ;;  %v973_v47 = vmul.f32 %v1967_v39, %v2989_v7  ;;  %1988 = vtanh.f32 %v472_v25  ;;  %v3122_v61 = vld [vmem:[%s2568_s30 + $0x2b0] sm:$0xff]  ;;  %v479_v63 = vmul.f32 2.5, %v3115_v56 }
  0x8a   : > { %v1971_v49 = vpop.eup %1970  ;;  %1482 = vst [vmem:[%s2667_s17 + $0x200] sm:$0xff] %v1226_v40  ;;  %v1228_v50 = vmin.f32 %v972_v42, %v2982_v2  ;;  %v974_v52 = vmul.f32 %v1969_v44, %v2996_v8  ;;  %1990 = vtanh.f32 %v473_v32  ;;  %v3129_v2 = vld [vmem:[%s2568_s30 + $0x2b8] sm:$0xff]  ;;  %v480_v4 = vmul.f32 2.5, %v3122_v61 }
  0x8b   : > { %v1973_v54 = vpop.eup %1972  ;;  %1483 = vst [vmem:[%s2667_s17 + $0x208] sm:$0xff] %v1227_v45  ;;  %v1229_v55 = vmin.f32 %v973_v47, %v2989_v7  ;;  %v975_v57 = vmul.f32 %v1971_v49, %v3003_v10  ;;  %1992 = vtanh.f32 %v474_v38  ;;  %v3136_v7 = vld [vmem:[%s2568_s30 + $0x2c0] sm:$0xff]  ;;  %v481_v11 = vmul.f32 2.5, %v3129_v2 }
  0x8c   : > { %v1975_v59 = vpop.eup %1974  ;;  %1484 = vst [vmem:[%s2667_s17 + $0x210] sm:$0xff] %v1228_v50  ;;  %v1230_v60 = vmin.f32 %v974_v52, %v2996_v8  ;;  %v976_v62 = vmul.f32 %v1973_v54, %v3010_v12  ;;  %1994 = vtanh.f32 %v475_v43  ;;  %v3143_v8 = vld [vmem:[%s2568_s30 + $0x2c8] sm:$0xff]  ;;  %v482_v19 = vmul.f32 2.5, %v3136_v7 }
  0x8d   : > { %v1977_v0 = vpop.eup %1976  ;;  %1485 = vst [vmem:[%s2667_s17 + $0x218] sm:$0xff] %v1229_v55  ;;  %v1231_v1 = vmin.f32 %v975_v57, %v3003_v10  ;;  %v977_v3 = vmul.f32 %v1975_v59, %v3017_v14  ;;  %1996 = vtanh.f32 %v476_v48  ;;  %v3150_v10 = vld [vmem:[%s2568_s30 + $0x2d0] sm:$0xff]  ;;  %v483_v27 = vmul.f32 2.5, %v3143_v8 }
  0x8e   : > { %v1979_v5 = vpop.eup %1978  ;;  %1486 = vst [vmem:[%s2667_s17 + $0x220] sm:$0xff] %v1230_v60  ;;  %v1232_v6 = vmin.f32 %v976_v62, %v3010_v12  ;;  %v978_v9 = vmul.f32 %v1977_v0, %v3024_v16  ;;  %1998 = vtanh.f32 %v477_v53  ;;  %v3157_v12 = vld [vmem:[%s2568_s30 + $0x2d8] sm:$0xff]  ;;  %v484_v34 = vmul.f32 2.5, %v3150_v10 }
  0x8f   : > { %v1981_v13 = vpop.eup %1980  ;;  %1487 = vst [vmem:[%s2667_s17 + $0x228] sm:$0xff] %v1231_v1  ;;  %v1233_v15 = vmin.f32 %v977_v3, %v3017_v14  ;;  %v979_v17 = vmul.f32 %v1979_v5, %v3031_v18  ;;  %2000 = vtanh.f32 %v478_v58  ;;  %v3164_v14 = vld [vmem:[%s2568_s30 + $0x2e0] sm:$0xff]  ;;  %v485_v39 = vmul.f32 2.5, %v3157_v12 }
  0x90   : > { %v1983_v21 = vpop.eup %1982  ;;  %1488 = vst [vmem:[%s2667_s17 + $0x230] sm:$0xff] %v1232_v6  ;;  %v1234_v23 = vmin.f32 %v978_v9, %v3024_v16  ;;  %v980_v25 = vmul.f32 %v1981_v13, %v3038_v20  ;;  %2002 = vtanh.f32 %v479_v63  ;;  %v3171_v16 = vld [vmem:[%s2568_s30 + $0x2e8] sm:$0xff]  ;;  %v486_v44 = vmul.f32 2.5, %v3164_v14 }
  0x91   : > { %v1985_v29 = vpop.eup %1984  ;;  %1489 = vst [vmem:[%s2667_s17 + $0x238] sm:$0xff] %v1233_v15  ;;  %v1235_v31 = vmin.f32 %v979_v17, %v3031_v18  ;;  %v981_v32 = vmul.f32 %v1983_v21, %v3045_v22  ;;  %2004 = vtanh.f32 %v480_v4  ;;  %v3178_v18 = vld [vmem:[%s2568_s30 + $0x2f0] sm:$0xff]  ;;  %v487_v49 = vmul.f32 2.5, %v3171_v16 }
  0x92   : > { %v1987_v35 = vpop.eup %1986  ;;  %1490 = vst [vmem:[%s2667_s17 + $0x240] sm:$0xff] %v1234_v23  ;;  %v1236_v36 = vmin.f32 %v980_v25, %v3038_v20  ;;  %v982_v38 = vmul.f32 %v1985_v29, %v3052_v24  ;;  %2006 = vtanh.f32 %v481_v11  ;;  %v3185_v20 = vld [vmem:[%s2568_s30 + $0x2f8] sm:$0xff]  ;;  %v488_v54 = vmul.f32 2.5, %v3178_v18 }
  0x93   : > { %v1989_v40 = vpop.eup %1988  ;;  %1491 = vst [vmem:[%s2667_s17 + $0x248] sm:$0xff] %v1235_v31  ;;  %v1237_v42 = vmin.f32 %v981_v32, %v3045_v22  ;;  %v983_v43 = vmul.f32 %v1987_v35, %v3059_v26  ;;  %2008 = vtanh.f32 %v482_v19  ;;  %v3192_v22 = vld [vmem:[%s2568_s30 + $0x300] sm:$0xff]  ;;  %v489_v59 = vmul.f32 2.5, %v3185_v20 }
  0x94   : > { %v1991_v45 = vpop.eup %1990  ;;  %1492 = vst [vmem:[%s2667_s17 + $0x250] sm:$0xff] %v1236_v36  ;;  %v1238_v47 = vmin.f32 %v982_v38, %v3052_v24  ;;  %v984_v48 = vmul.f32 %v1989_v40, %v3066_v28  ;;  %2010 = vtanh.f32 %v483_v27  ;;  %v3199_v24 = vld [vmem:[%s2568_s30 + $0x308] sm:$0xff]  ;;  %v490_v0 = vmul.f32 2.5, %v3192_v22 }
  0x95   : > { %v1993_v50 = vpop.eup %1992  ;;  %1493 = vst [vmem:[%s2667_s17 + $0x258] sm:$0xff] %v1237_v42  ;;  %v1239_v52 = vmin.f32 %v983_v43, %v3059_v26  ;;  %v985_v53 = vmul.f32 %v1991_v45, %v3073_v30  ;;  %2012 = vtanh.f32 %v484_v34  ;;  %v3206_v26 = vld [vmem:[%s2568_s30 + $0x310] sm:$0xff]  ;;  %v491_v5 = vmul.f32 2.5, %v3199_v24 }
  0x96   : > { %v1995_v55 = vpop.eup %1994  ;;  %1494 = vst [vmem:[%s2667_s17 + $0x260] sm:$0xff] %v1238_v47  ;;  %v1240_v57 = vmin.f32 %v984_v48, %v3066_v28  ;;  %v986_v58 = vmul.f32 %v1993_v50, %v3080_v33  ;;  %2014 = vtanh.f32 %v485_v39  ;;  %v3213_v28 = vld [vmem:[%s2568_s30 + $0x318] sm:$0xff]  ;;  %v492_v13 = vmul.f32 2.5, %v3206_v26 }
  0x97   : > { %v1997_v60 = vpop.eup %1996  ;;  %1495 = vst [vmem:[%s2667_s17 + $0x268] sm:$0xff] %v1239_v52  ;;  %v1241_v62 = vmin.f32 %v985_v53, %v3073_v30  ;;  %v987_v63 = vmul.f32 %v1995_v55, %v3087_v37  ;;  %2016 = vtanh.f32 %v486_v44  ;;  %v3220_v30 = vld [vmem:[%s2568_s30 + $0x320] sm:$0xff]  ;;  %v493_v21 = vmul.f32 2.5, %v3213_v28 }
  0x98   : > { %v1999_v1 = vpop.eup %1998  ;;  %1496 = vst [vmem:[%s2667_s17 + $0x270] sm:$0xff] %v1240_v57  ;;  %v1242_v3 = vmin.f32 %v986_v58, %v3080_v33  ;;  %v988_v4 = vmul.f32 %v1997_v60, %v3094_v41  ;;  %2018 = vtanh.f32 %v487_v49  ;;  %v3227_v33 = vld [vmem:[%s2568_s30 + $0x328] sm:$0xff]  ;;  %v494_v29 = vmul.f32 2.5, %v3220_v30 }
  0x99   : > { %v2001_v6 = vpop.eup %2000  ;;  %1497 = vst [vmem:[%s2667_s17 + $0x278] sm:$0xff] %v1241_v62  ;;  %v1243_v9 = vmin.f32 %v987_v63, %v3087_v37  ;;  %v989_v11 = vmul.f32 %v1999_v1, %v3101_v46  ;;  %2020 = vtanh.f32 %v488_v54  ;;  %v3234_v37 = vld [vmem:[%s2568_s30 + $0x330] sm:$0xff]  ;;  %v495_v35 = vmul.f32 2.5, %v3227_v33 }
  0x9a   : > { %v2003_v15 = vpop.eup %2002  ;;  %1498 = vst [vmem:[%s2667_s17 + $0x280] sm:$0xff] %v1242_v3  ;;  %v1244_v17 = vmin.f32 %v988_v4, %v3094_v41  ;;  %v990_v19 = vmul.f32 %v2001_v6, %v3108_v51  ;;  %2022 = vtanh.f32 %v489_v59  ;;  %v3241_v41 = vld [vmem:[%s2568_s30 + $0x338] sm:$0xff]  ;;  %v496_v40 = vmul.f32 2.5, %v3234_v37 }
  0x9b   : > { %v2005_v23 = vpop.eup %2004  ;;  %1499 = vst [vmem:[%s2667_s17 + $0x288] sm:$0xff] %v1243_v9  ;;  %v1245_v25 = vmin.f32 %v989_v11, %v3101_v46  ;;  %v991_v27 = vmul.f32 %v2003_v15, %v3115_v56  ;;  %2024 = vtanh.f32 %v490_v0  ;;  %v3248_v46 = vld [vmem:[%s2568_s30 + $0x340] sm:$0xff]  ;;  %v497_v45 = vmul.f32 2.5, %v3241_v41 }
  0x9c   : > { %v2007_v31 = vpop.eup %2006  ;;  %1500 = vst [vmem:[%s2667_s17 + $0x290] sm:$0xff] %v1244_v17  ;;  %v1246_v32 = vmin.f32 %v990_v19, %v3108_v51  ;;  %v992_v34 = vmul.f32 %v2005_v23, %v3122_v61  ;;  %2026 = vtanh.f32 %v491_v5  ;;  %v3255_v51 = vld [vmem:[%s2568_s30 + $0x348] sm:$0xff]  ;;  %v498_v50 = vmul.f32 2.5, %v3248_v46 }
  0x9d   : > { %v2009_v36 = vpop.eup %2008  ;;  %1501 = vst [vmem:[%s2667_s17 + $0x298] sm:$0xff] %v1245_v25  ;;  %v1247_v38 = vmin.f32 %v991_v27, %v3115_v56  ;;  %v993_v39 = vmul.f32 %v2007_v31, %v3129_v2  ;;  %2028 = vtanh.f32 %v492_v13  ;;  %v3262_v56 = vld [vmem:[%s2568_s30 + $0x350] sm:$0xff]  ;;  %v499_v55 = vmul.f32 2.5, %v3255_v51 }
  0x9e   : > { %v2011_v42 = vpop.eup %2010  ;;  %1502 = vst [vmem:[%s2667_s17 + $0x2a0] sm:$0xff] %v1246_v32  ;;  %v1248_v43 = vmin.f32 %v992_v34, %v3122_v61  ;;  %v994_v44 = vmul.f32 %v2009_v36, %v3136_v7  ;;  %2030 = vtanh.f32 %v493_v21  ;;  %v3269_v61 = vld [vmem:[%s2568_s30 + $0x358] sm:$0xff]  ;;  %v500_v60 = vmul.f32 2.5, %v3262_v56 }
  0x9f   : > { %v2013_v47 = vpop.eup %2012  ;;  %1503 = vst [vmem:[%s2667_s17 + $0x2a8] sm:$0xff] %v1247_v38  ;;  %v1249_v48 = vmin.f32 %v993_v39, %v3129_v2  ;;  %v995_v49 = vmul.f32 %v2011_v42, %v3143_v8  ;;  %2032 = vtanh.f32 %v494_v29  ;;  %v3276_v2 = vld [vmem:[%s2568_s30 + $0x360] sm:$0xff]  ;;  %v501_v1 = vmul.f32 2.5, %v3269_v61 }
  0xa0   : > { %v2015_v52 = vpop.eup %2014  ;;  %1504 = vst [vmem:[%s2667_s17 + $0x2b0] sm:$0xff] %v1248_v43  ;;  %v1250_v53 = vmin.f32 %v994_v44, %v3136_v7  ;;  %v996_v54 = vmul.f32 %v2013_v47, %v3150_v10  ;;  %2034 = vtanh.f32 %v495_v35  ;;  %v3283_v7 = vld [vmem:[%s2568_s30 + $0x368] sm:$0xff]  ;;  %v502_v6 = vmul.f32 2.5, %v3276_v2 }
  0xa1   : > { %v2017_v57 = vpop.eup %2016  ;;  %1505 = vst [vmem:[%s2667_s17 + $0x2b8] sm:$0xff] %v1249_v48  ;;  %v1251_v58 = vmin.f32 %v995_v49, %v3143_v8  ;;  %v997_v59 = vmul.f32 %v2015_v52, %v3157_v12  ;;  %2036 = vtanh.f32 %v496_v40  ;;  %v3290_v8 = vld [vmem:[%s2568_s30 + $0x370] sm:$0xff]  ;;  %v503_v15 = vmul.f32 2.5, %v3283_v7 }
  0xa2   : > { %v2019_v62 = vpop.eup %2018  ;;  %1506 = vst [vmem:[%s2667_s17 + $0x2c0] sm:$0xff] %v1250_v53  ;;  %v1252_v63 = vmin.f32 %v996_v54, %v3150_v10  ;;  %v998_v0 = vmul.f32 %v2017_v57, %v3164_v14  ;;  %2038 = vtanh.f32 %v497_v45  ;;  %v3297_v10 = vld [vmem:[%s2568_s30 + $0x378] sm:$0xff]  ;;  %v504_v23 = vmul.f32 2.5, %v3290_v8 }
  0xa3   : > { %v2021_v3 = vpop.eup %2020  ;;  %1507 = vst [vmem:[%s2667_s17 + $0x2c8] sm:$0xff] %v1251_v58  ;;  %v1253_v4 = vmin.f32 %v997_v59, %v3157_v12  ;;  %v999_v5 = vmul.f32 %v2019_v62, %v3171_v16  ;;  %2040 = vtanh.f32 %v498_v50  ;;  %v3304_v12 = vld [vmem:[%s2568_s30 + $0x380] sm:$0xff]  ;;  %v505_v31 = vmul.f32 2.5, %v3297_v10 }
  0xa4   : > { %v2023_v9 = vpop.eup %2022  ;;  %1508 = vst [vmem:[%s2667_s17 + $0x2d0] sm:$0xff] %v1252_v63  ;;  %v1254_v11 = vmin.f32 %v998_v0, %v3164_v14  ;;  %v1000_v13 = vmul.f32 %v2021_v3, %v3178_v18  ;;  %2042 = vtanh.f32 %v499_v55  ;;  %v3311_v14 = vld [vmem:[%s2568_s30 + $0x388] sm:$0xff]  ;;  %v506_v36 = vmul.f32 2.5, %v3304_v12 }
  0xa5   : > { %v2025_v17 = vpop.eup %2024  ;;  %1509 = vst [vmem:[%s2667_s17 + $0x2d8] sm:$0xff] %v1253_v4  ;;  %v1255_v19 = vmin.f32 %v999_v5, %v3171_v16  ;;  %v1001_v21 = vmul.f32 %v2023_v9, %v3185_v20  ;;  %2044 = vtanh.f32 %v500_v60  ;;  %v3318_v16 = vld [vmem:[%s2568_s30 + $0x390] sm:$0xff]  ;;  %v507_v42 = vmul.f32 2.5, %v3311_v14 }
  0xa6   : > { %v2027_v25 = vpop.eup %2026  ;;  %1510 = vst [vmem:[%s2667_s17 + $0x2e0] sm:$0xff] %v1254_v11  ;;  %v1256_v27 = vmin.f32 %v1000_v13, %v3178_v18  ;;  %v1002_v29 = vmul.f32 %v2025_v17, %v3192_v22  ;;  %2046 = vtanh.f32 %v501_v1  ;;  %v3325_v18 = vld [vmem:[%s2568_s30 + $0x398] sm:$0xff]  ;;  %v508_v47 = vmul.f32 2.5, %v3318_v16 }
  0xa7   : > { %v2029_v32 = vpop.eup %2028  ;;  %1511 = vst [vmem:[%s2667_s17 + $0x2e8] sm:$0xff] %v1255_v19  ;;  %v1257_v34 = vmin.f32 %v1001_v21, %v3185_v20  ;;  %v1003_v35 = vmul.f32 %v2027_v25, %v3199_v24  ;;  %2048 = vtanh.f32 %v502_v6  ;;  %v3332_v20 = vld [vmem:[%s2568_s30 + $0x3a0] sm:$0xff]  ;;  %v509_v52 = vmul.f32 2.5, %v3325_v18 }
  0xa8   : > { %v2031_v38 = vpop.eup %2030  ;;  %1512 = vst [vmem:[%s2667_s17 + $0x2f0] sm:$0xff] %v1256_v27  ;;  %v1258_v39 = vmin.f32 %v1002_v29, %v3192_v22  ;;  %v1004_v40 = vmul.f32 %v2029_v32, %v3206_v26  ;;  %2050 = vtanh.f32 %v503_v15  ;;  %v3339_v22 = vld [vmem:[%s2568_s30 + $0x3a8] sm:$0xff]  ;;  %v510_v57 = vmul.f32 2.5, %v3332_v20 }
  0xa9   : > { %v2033_v43 = vpop.eup %2032  ;;  %1513 = vst [vmem:[%s2667_s17 + $0x2f8] sm:$0xff] %v1257_v34  ;;  %v1259_v44 = vmin.f32 %v1003_v35, %v3199_v24  ;;  %v1005_v45 = vmul.f32 %v2031_v38, %v3213_v28  ;;  %2052 = vtanh.f32 %v504_v23  ;;  %v3346_v24 = vld [vmem:[%s2568_s30 + $0x3b0] sm:$0xff]  ;;  %v511_v62 = vmul.f32 2.5, %v3339_v22 }
  0xaa   : > { %v2035_v48 = vpop.eup %2034  ;;  %1514 = vst [vmem:[%s2667_s17 + $0x300] sm:$0xff] %v1258_v39  ;;  %v1260_v49 = vmin.f32 %v1004_v40, %v3206_v26  ;;  %v1006_v50 = vmul.f32 %v2033_v43, %v3220_v30  ;;  %2054 = vtanh.f32 %v505_v31  ;;  %v3353_v26 = vld [vmem:[%s2568_s30 + $0x3b8] sm:$0xff]  ;;  %v512_v3 = vmul.f32 2.5, %v3346_v24 }
  0xab   : > { %v2037_v53 = vpop.eup %2036  ;;  %1515 = vst [vmem:[%s2667_s17 + $0x308] sm:$0xff] %v1259_v44  ;;  %v1261_v54 = vmin.f32 %v1005_v45, %v3213_v28  ;;  %v1007_v55 = vmul.f32 %v2035_v48, %v3227_v33  ;;  %2056 = vtanh.f32 %v506_v36  ;;  %v3360_v28 = vld [vmem:[%s2568_s30 + $0x3c0] sm:$0xff]  ;;  %v513_v9 = vmul.f32 2.5, %v3353_v26 }
  0xac   : > { %v2039_v58 = vpop.eup %2038  ;;  %1516 = vst [vmem:[%s2667_s17 + $0x310] sm:$0xff] %v1260_v49  ;;  %v1262_v59 = vmin.f32 %v1006_v50, %v3220_v30  ;;  %v1008_v60 = vmul.f32 %v2037_v53, %v3234_v37  ;;  %2058 = vtanh.f32 %v507_v42  ;;  %v3367_v30 = vld [vmem:[%s2568_s30 + $0x3c8] sm:$0xff]  ;;  %v514_v17 = vmul.f32 2.5, %v3360_v28 }
  0xad   : > { %v2041_v63 = vpop.eup %2040  ;;  %1517 = vst [vmem:[%s2667_s17 + $0x318] sm:$0xff] %v1261_v54  ;;  %v1263_v0 = vmin.f32 %v1007_v55, %v3227_v33  ;;  %v1009_v1 = vmul.f32 %v2039_v58, %v3241_v41  ;;  %2060 = vtanh.f32 %v508_v47  ;;  %v3374_v33 = vld [vmem:[%s2568_s30 + $0x3d0] sm:$0xff]  ;;  %v515_v25 = vmul.f32 2.5, %v3367_v30 }
  0xae   : > { %v2043_v4 = vpop.eup %2042  ;;  %1518 = vst [vmem:[%s2667_s17 + $0x320] sm:$0xff] %v1262_v59  ;;  %v1264_v5 = vmin.f32 %v1008_v60, %v3234_v37  ;;  %v1010_v6 = vmul.f32 %v2041_v63, %v3248_v46  ;;  %2062 = vtanh.f32 %v509_v52  ;;  %v3381_v37 = vld [vmem:[%s2568_s30 + $0x3d8] sm:$0xff]  ;;  %v516_v32 = vmul.f32 2.5, %v3374_v33 }
  0xaf   : > { %v2045_v11 = vpop.eup %2044  ;;  %1519 = vst [vmem:[%s2667_s17 + $0x328] sm:$0xff] %v1263_v0  ;;  %v1265_v13 = vmin.f32 %v1009_v1, %v3241_v41  ;;  %v1011_v15 = vmul.f32 %v2043_v4, %v3255_v51  ;;  %2064 = vtanh.f32 %v510_v57  ;;  %v3388_v41 = vld [vmem:[%s2568_s30 + $0x3e0] sm:$0xff]  ;;  %v517_v38 = vmul.f32 2.5, %v3381_v37 }
  0xb0   : > { %v2047_v19 = vpop.eup %2046  ;;  %1520 = vst [vmem:[%s2667_s17 + $0x330] sm:$0xff] %v1264_v5  ;;  %v1266_v21 = vmin.f32 %v1010_v6, %v3248_v46  ;;  %v1012_v23 = vmul.f32 %v2045_v11, %v3262_v56  ;;  %2066 = vtanh.f32 %v511_v62  ;;  %v3395_v46 = vld [vmem:[%s2568_s30 + $0x3e8] sm:$0xff]  ;;  %v518_v43 = vmul.f32 2.5, %v3388_v41 }
  0xb1   : > { %v2049_v27 = vpop.eup %2048  ;;  %1521 = vst [vmem:[%s2667_s17 + $0x338] sm:$0xff] %v1265_v13  ;;  %v1267_v29 = vmin.f32 %v1011_v15, %v3255_v51  ;;  %v1013_v31 = vmul.f32 %v2047_v19, %v3269_v61  ;;  %2068 = vtanh.f32 %v512_v3  ;;  %v3402_v51 = vld [vmem:[%s2568_s30 + $0x3f0] sm:$0xff]  ;;  %v519_v48 = vmul.f32 2.5, %v3395_v46 }
  0xb2   : > { %v2051_v34 = vpop.eup %2050  ;;  %1522 = vst [vmem:[%s2667_s17 + $0x340] sm:$0xff] %v1266_v21  ;;  %v1268_v35 = vmin.f32 %v1012_v23, %v3262_v56  ;;  %v1014_v36 = vmul.f32 %v2049_v27, %v3276_v2  ;;  %2070 = vtanh.f32 %v513_v9  ;;  %v3409_v56 = vld [vmem:[%s2568_s30 + $0x3f8] sm:$0xff]  ;;  %v520_v53 = vmul.f32 2.5, %v3402_v51 }
  0xb3   : > { %v2053_v39 = vpop.eup %2052  ;;  %1523 = vst [vmem:[%s2667_s17 + $0x348] sm:$0xff] %v1267_v29  ;;  %v1269_v40 = vmin.f32 %v1013_v31, %v3269_v61  ;;  %v1015_v42 = vmul.f32 %v2051_v34, %v3283_v7  ;;  %2072 = vtanh.f32 %v514_v17  ;;  %v3416_v61 = vld [vmem:[%s2568_s30 + $0x400] sm:$0xff]  ;;  %v521_v58 = vmul.f32 2.5, %v3409_v56 }
  0xb4   : > { %v2055_v44 = vpop.eup %2054  ;;  %1524 = vst [vmem:[%s2667_s17 + $0x350] sm:$0xff] %v1268_v35  ;;  %v1270_v45 = vmin.f32 %v1014_v36, %v3276_v2  ;;  %v1016_v47 = vmul.f32 %v2053_v39, %v3290_v8  ;;  %2074 = vtanh.f32 %v515_v25  ;;  %v3423_v2 = vld [vmem:[%s2568_s30 + $0x408] sm:$0xff]  ;;  %v522_v63 = vmul.f32 2.5, %v3416_v61 }
  0xb5   : > { %v2057_v49 = vpop.eup %2056  ;;  %1525 = vst [vmem:[%s2667_s17 + $0x358] sm:$0xff] %v1269_v40  ;;  %v1271_v50 = vmin.f32 %v1015_v42, %v3283_v7  ;;  %v1017_v52 = vmul.f32 %v2055_v44, %v3297_v10  ;;  %2076 = vtanh.f32 %v516_v32  ;;  %v3430_v7 = vld [vmem:[%s2568_s30 + $0x410] sm:$0xff]  ;;  %v523_v4 = vmul.f32 2.5, %v3423_v2 }
  0xb6   : > { %v2059_v54 = vpop.eup %2058  ;;  %1526 = vst [vmem:[%s2667_s17 + $0x360] sm:$0xff] %v1270_v45  ;;  %v1272_v55 = vmin.f32 %v1016_v47, %v3290_v8  ;;  %v1018_v57 = vmul.f32 %v2057_v49, %v3304_v12  ;;  %2078 = vtanh.f32 %v517_v38  ;;  %v3437_v8 = vld [vmem:[%s2568_s30 + $0x418] sm:$0xff]  ;;  %v524_v11 = vmul.f32 2.5, %v3430_v7 }
  0xb7   : > { %v2061_v59 = vpop.eup %2060  ;;  %1527 = vst [vmem:[%s2667_s17 + $0x368] sm:$0xff] %v1271_v50  ;;  %v1273_v60 = vmin.f32 %v1017_v52, %v3297_v10  ;;  %v1019_v62 = vmul.f32 %v2059_v54, %v3311_v14  ;;  %2080 = vtanh.f32 %v518_v43  ;;  %v3444_v10 = vld [vmem:[%s2568_s30 + $0x420] sm:$0xff]  ;;  %v525_v19 = vmul.f32 2.5, %v3437_v8 }
  0xb8   : > { %v2063_v0 = vpop.eup %2062  ;;  %1528 = vst [vmem:[%s2667_s17 + $0x370] sm:$0xff] %v1272_v55  ;;  %v1274_v1 = vmin.f32 %v1018_v57, %v3304_v12  ;;  %v1020_v3 = vmul.f32 %v2061_v59, %v3318_v16  ;;  %2082 = vtanh.f32 %v519_v48  ;;  %v3451_v12 = vld [vmem:[%s2568_s30 + $0x428] sm:$0xff]  ;;  %v526_v27 = vmul.f32 2.5, %v3444_v10 }
  0xb9   : > { %v2065_v5 = vpop.eup %2064  ;;  %1529 = vst [vmem:[%s2667_s17 + $0x378] sm:$0xff] %v1273_v60  ;;  %v1275_v6 = vmin.f32 %v1019_v62, %v3311_v14  ;;  %v1021_v9 = vmul.f32 %v2063_v0, %v3325_v18  ;;  %2084 = vtanh.f32 %v520_v53  ;;  %v3458_v14 = vld [vmem:[%s2568_s30 + $0x430] sm:$0xff]  ;;  %v527_v34 = vmul.f32 2.5, %v3451_v12 }
  0xba   : > { %v2067_v13 = vpop.eup %2066  ;;  %1530 = vst [vmem:[%s2667_s17 + $0x380] sm:$0xff] %v1274_v1  ;;  %v1276_v15 = vmin.f32 %v1020_v3, %v3318_v16  ;;  %v1022_v17 = vmul.f32 %v2065_v5, %v3332_v20  ;;  %2086 = vtanh.f32 %v521_v58  ;;  %v3465_v16 = vld [vmem:[%s2568_s30 + $0x438] sm:$0xff]  ;;  %v528_v39 = vmul.f32 2.5, %v3458_v14 }
  0xbb   : > { %v2069_v21 = vpop.eup %2068  ;;  %1531 = vst [vmem:[%s2667_s17 + $0x388] sm:$0xff] %v1275_v6  ;;  %v1277_v23 = vmin.f32 %v1021_v9, %v3325_v18  ;;  %v1023_v25 = vmul.f32 %v2067_v13, %v3339_v22  ;;  %2088 = vtanh.f32 %v522_v63  ;;  %v3472_v18 = vld [vmem:[%s2568_s30 + $0x440] sm:$0xff]  ;;  %v529_v44 = vmul.f32 2.5, %v3465_v16 }
  0xbc   : > { %v2071_v29 = vpop.eup %2070  ;;  %1532 = vst [vmem:[%s2667_s17 + $0x390] sm:$0xff] %v1276_v15  ;;  %v1278_v31 = vmin.f32 %v1022_v17, %v3332_v20  ;;  %v1024_v32 = vmul.f32 %v2069_v21, %v3346_v24  ;;  %2090 = vtanh.f32 %v523_v4  ;;  %v3479_v20 = vld [vmem:[%s2568_s30 + $0x448] sm:$0xff]  ;;  %v530_v49 = vmul.f32 2.5, %v3472_v18 }
  0xbd   : > { %v2073_v35 = vpop.eup %2072  ;;  %1533 = vst [vmem:[%s2667_s17 + $0x398] sm:$0xff] %v1277_v23  ;;  %v1279_v36 = vmin.f32 %v1023_v25, %v3339_v22  ;;  %v1025_v38 = vmul.f32 %v2071_v29, %v3353_v26  ;;  %2092 = vtanh.f32 %v524_v11  ;;  %v3486_v22 = vld [vmem:[%s2568_s30 + $0x450] sm:$0xff]  ;;  %v531_v54 = vmul.f32 2.5, %v3479_v20 }
  0xbe   : > { %v2075_v40 = vpop.eup %2074  ;;  %1534 = vst [vmem:[%s2667_s17 + $0x3a0] sm:$0xff] %v1278_v31  ;;  %v1280_v42 = vmin.f32 %v1024_v32, %v3346_v24  ;;  %v1026_v43 = vmul.f32 %v2073_v35, %v3360_v28  ;;  %2094 = vtanh.f32 %v525_v19  ;;  %v3493_v24 = vld [vmem:[%s2568_s30 + $0x458] sm:$0xff]  ;;  %v532_v59 = vmul.f32 2.5, %v3486_v22 }
  0xbf   : > { %v2077_v45 = vpop.eup %2076  ;;  %1535 = vst [vmem:[%s2667_s17 + $0x3a8] sm:$0xff] %v1279_v36  ;;  %v1281_v47 = vmin.f32 %v1025_v38, %v3353_v26  ;;  %v1027_v48 = vmul.f32 %v2075_v40, %v3367_v30  ;;  %2096 = vtanh.f32 %v526_v27  ;;  %v3500_v26 = vld [vmem:[%s2568_s30 + $0x460] sm:$0xff]  ;;  %v533_v0 = vmul.f32 2.5, %v3493_v24 }
  0xc0   : > { %v2079_v50 = vpop.eup %2078  ;;  %1536 = vst [vmem:[%s2667_s17 + $0x3b0] sm:$0xff] %v1280_v42  ;;  %v1282_v52 = vmin.f32 %v1026_v43, %v3360_v28  ;;  %v1028_v53 = vmul.f32 %v2077_v45, %v3374_v33  ;;  %2098 = vtanh.f32 %v527_v34  ;;  %v3507_v28 = vld [vmem:[%s2568_s30 + $0x468] sm:$0xff]  ;;  %v534_v5 = vmul.f32 2.5, %v3500_v26 }
  0xc1   : > { %v2081_v55 = vpop.eup %2080  ;;  %1537 = vst [vmem:[%s2667_s17 + $0x3b8] sm:$0xff] %v1281_v47  ;;  %v1283_v57 = vmin.f32 %v1027_v48, %v3367_v30  ;;  %v1029_v58 = vmul.f32 %v2079_v50, %v3381_v37  ;;  %2100 = vtanh.f32 %v528_v39  ;;  %v3514_v30 = vld [vmem:[%s2568_s30 + $0x470] sm:$0xff]  ;;  %v535_v13 = vmul.f32 2.5, %v3507_v28 }
  0xc2   : > { %v2083_v60 = vpop.eup %2082  ;;  %1538 = vst [vmem:[%s2667_s17 + $0x3c0] sm:$0xff] %v1282_v52  ;;  %v1284_v62 = vmin.f32 %v1028_v53, %v3374_v33  ;;  %v1030_v63 = vmul.f32 %v2081_v55, %v3388_v41  ;;  %2102 = vtanh.f32 %v529_v44  ;;  %v3521_v33 = vld [vmem:[%s2568_s30 + $0x478] sm:$0xff]  ;;  %v536_v21 = vmul.f32 2.5, %v3514_v30 }
  0xc3   : > { %v2085_v1 = vpop.eup %2084  ;;  %1539 = vst [vmem:[%s2667_s17 + $0x3c8] sm:$0xff] %v1283_v57  ;;  %v1285_v3 = vmin.f32 %v1029_v58, %v3381_v37  ;;  %v1031_v4 = vmul.f32 %v2083_v60, %v3395_v46  ;;  %2104 = vtanh.f32 %v530_v49  ;;  %v3528_v37 = vld [vmem:[%s2568_s30 + $0x480] sm:$0xff]  ;;  %v537_v29 = vmul.f32 2.5, %v3521_v33 }
  0xc4   : > { %v2087_v6 = vpop.eup %2086  ;;  %1540 = vst [vmem:[%s2667_s17 + $0x3d0] sm:$0xff] %v1284_v62  ;;  %v1286_v9 = vmin.f32 %v1030_v63, %v3388_v41  ;;  %v1032_v11 = vmul.f32 %v2085_v1, %v3402_v51  ;;  %2106 = vtanh.f32 %v531_v54  ;;  %v3535_v41 = vld [vmem:[%s2568_s30 + $0x488] sm:$0xff]  ;;  %v538_v35 = vmul.f32 2.5, %v3528_v37 }
  0xc5   : > { %v2089_v15 = vpop.eup %2088  ;;  %1541 = vst [vmem:[%s2667_s17 + $0x3d8] sm:$0xff] %v1285_v3  ;;  %v1287_v17 = vmin.f32 %v1031_v4, %v3395_v46  ;;  %v1033_v19 = vmul.f32 %v2087_v6, %v3409_v56  ;;  %2108 = vtanh.f32 %v532_v59  ;;  %v3542_v46 = vld [vmem:[%s2568_s30 + $0x490] sm:$0xff]  ;;  %v539_v40 = vmul.f32 2.5, %v3535_v41 }
  0xc6   : > { %v2091_v23 = vpop.eup %2090  ;;  %1542 = vst [vmem:[%s2667_s17 + $0x3e0] sm:$0xff] %v1286_v9  ;;  %v1288_v25 = vmin.f32 %v1032_v11, %v3402_v51  ;;  %v1034_v27 = vmul.f32 %v2089_v15, %v3416_v61  ;;  %2110 = vtanh.f32 %v533_v0  ;;  %v3549_v51 = vld [vmem:[%s2568_s30 + $0x498] sm:$0xff]  ;;  %v540_v45 = vmul.f32 2.5, %v3542_v46 }
  0xc7   : > { %v2093_v31 = vpop.eup %2092  ;;  %1543 = vst [vmem:[%s2667_s17 + $0x3e8] sm:$0xff] %v1287_v17  ;;  %v1289_v32 = vmin.f32 %v1033_v19, %v3409_v56  ;;  %v1035_v34 = vmul.f32 %v2091_v23, %v3423_v2  ;;  %2112 = vtanh.f32 %v534_v5  ;;  %v3556_v56 = vld [vmem:[%s2568_s30 + $0x4a0] sm:$0xff]  ;;  %v541_v50 = vmul.f32 2.5, %v3549_v51 }
  0xc8   : > { %v2095_v36 = vpop.eup %2094  ;;  %1544 = vst [vmem:[%s2667_s17 + $0x3f0] sm:$0xff] %v1288_v25  ;;  %v1290_v38 = vmin.f32 %v1034_v27, %v3416_v61  ;;  %v1036_v39 = vmul.f32 %v2093_v31, %v3430_v7  ;;  %2114 = vtanh.f32 %v535_v13  ;;  %v3563_v61 = vld [vmem:[%s2568_s30 + $0x4a8] sm:$0xff]  ;;  %v542_v55 = vmul.f32 2.5, %v3556_v56 }
  0xc9   : > { %v2097_v42 = vpop.eup %2096  ;;  %1545 = vst [vmem:[%s2667_s17 + $0x3f8] sm:$0xff] %v1289_v32  ;;  %v1291_v43 = vmin.f32 %v1035_v34, %v3423_v2  ;;  %v1037_v44 = vmul.f32 %v2095_v36, %v3437_v8  ;;  %2116 = vtanh.f32 %v536_v21  ;;  %v3570_v2 = vld [vmem:[%s2568_s30 + $0x4b0] sm:$0xff]  ;;  %v543_v60 = vmul.f32 2.5, %v3563_v61 }
  0xca   : > { %v2099_v47 = vpop.eup %2098  ;;  %1546 = vst [vmem:[%s2667_s17 + $0x400] sm:$0xff] %v1290_v38  ;;  %v1292_v48 = vmin.f32 %v1036_v39, %v3430_v7  ;;  %v1038_v49 = vmul.f32 %v2097_v42, %v3444_v10  ;;  %2118 = vtanh.f32 %v537_v29  ;;  %v3577_v7 = vld [vmem:[%s2568_s30 + $0x4b8] sm:$0xff]  ;;  %v544_v1 = vmul.f32 2.5, %v3570_v2 }
  0xcb   : > { %v2101_v52 = vpop.eup %2100  ;;  %1547 = vst [vmem:[%s2667_s17 + $0x408] sm:$0xff] %v1291_v43  ;;  %v1293_v53 = vmin.f32 %v1037_v44, %v3437_v8  ;;  %v1039_v54 = vmul.f32 %v2099_v47, %v3451_v12  ;;  %2120 = vtanh.f32 %v538_v35  ;;  %v3584_v8 = vld [vmem:[%s2568_s30 + $0x4c0] sm:$0xff]  ;;  %v545_v6 = vmul.f32 2.5, %v3577_v7 }
  0xcc   : > { %v2103_v57 = vpop.eup %2102  ;;  %1548 = vst [vmem:[%s2667_s17 + $0x410] sm:$0xff] %v1292_v48  ;;  %v1294_v58 = vmin.f32 %v1038_v49, %v3444_v10  ;;  %v1040_v59 = vmul.f32 %v2101_v52, %v3458_v14  ;;  %2122 = vtanh.f32 %v539_v40  ;;  %v3591_v10 = vld [vmem:[%s2568_s30 + $0x4c8] sm:$0xff]  ;;  %v546_v15 = vmul.f32 2.5, %v3584_v8 }
  0xcd   : > { %v2105_v62 = vpop.eup %2104  ;;  %1549 = vst [vmem:[%s2667_s17 + $0x418] sm:$0xff] %v1293_v53  ;;  %v1295_v63 = vmin.f32 %v1039_v54, %v3451_v12  ;;  %v1041_v0 = vmul.f32 %v2103_v57, %v3465_v16  ;;  %2124 = vtanh.f32 %v540_v45  ;;  %v3598_v12 = vld [vmem:[%s2568_s30 + $0x4d0] sm:$0xff]  ;;  %v547_v23 = vmul.f32 2.5, %v3591_v10 }
  0xce   : > { %v2107_v3 = vpop.eup %2106  ;;  %1550 = vst [vmem:[%s2667_s17 + $0x420] sm:$0xff] %v1294_v58  ;;  %v1296_v4 = vmin.f32 %v1040_v59, %v3458_v14  ;;  %v1042_v5 = vmul.f32 %v2105_v62, %v3472_v18  ;;  %2126 = vtanh.f32 %v541_v50  ;;  %v3605_v14 = vld [vmem:[%s2568_s30 + $0x4d8] sm:$0xff]  ;;  %v548_v31 = vmul.f32 2.5, %v3598_v12 }
  0xcf   : > { %v2109_v9 = vpop.eup %2108  ;;  %1551 = vst [vmem:[%s2667_s17 + $0x428] sm:$0xff] %v1295_v63  ;;  %v1297_v11 = vmin.f32 %v1041_v0, %v3465_v16  ;;  %v1043_v13 = vmul.f32 %v2107_v3, %v3479_v20  ;;  %2128 = vtanh.f32 %v542_v55  ;;  %v3612_v16 = vld [vmem:[%s2568_s30 + $0x4e0] sm:$0xff]  ;;  %v549_v36 = vmul.f32 2.5, %v3605_v14 }
  0xd0   : > { %v2111_v17 = vpop.eup %2110  ;;  %1552 = vst [vmem:[%s2667_s17 + $0x430] sm:$0xff] %v1296_v4  ;;  %v1298_v19 = vmin.f32 %v1042_v5, %v3472_v18  ;;  %v1044_v21 = vmul.f32 %v2109_v9, %v3486_v22  ;;  %2130 = vtanh.f32 %v543_v60  ;;  %v3619_v18 = vld [vmem:[%s2568_s30 + $0x4e8] sm:$0xff]  ;;  %v550_v42 = vmul.f32 2.5, %v3612_v16 }
  0xd1   : > { %v2113_v25 = vpop.eup %2112  ;;  %1553 = vst [vmem:[%s2667_s17 + $0x438] sm:$0xff] %v1297_v11  ;;  %v1299_v27 = vmin.f32 %v1043_v13, %v3479_v20  ;;  %v1045_v29 = vmul.f32 %v2111_v17, %v3493_v24  ;;  %2132 = vtanh.f32 %v544_v1  ;;  %v3626_v20 = vld [vmem:[%s2568_s30 + $0x4f0] sm:$0xff]  ;;  %v551_v47 = vmul.f32 2.5, %v3619_v18 }
  0xd2   : > { %v2115_v32 = vpop.eup %2114  ;;  %1554 = vst [vmem:[%s2667_s17 + $0x440] sm:$0xff] %v1298_v19  ;;  %v1300_v34 = vmin.f32 %v1044_v21, %v3486_v22  ;;  %v1046_v35 = vmul.f32 %v2113_v25, %v3500_v26  ;;  %2134 = vtanh.f32 %v545_v6  ;;  %v3633_v22 = vld [vmem:[%s2568_s30 + $0x4f8] sm:$0xff]  ;;  %v552_v52 = vmul.f32 2.5, %v3626_v20 }
  0xd3   : > { %v2117_v38 = vpop.eup %2116  ;;  %1555 = vst [vmem:[%s2667_s17 + $0x448] sm:$0xff] %v1299_v27  ;;  %v1301_v39 = vmin.f32 %v1045_v29, %v3493_v24  ;;  %v1047_v40 = vmul.f32 %v2115_v32, %v3507_v28  ;;  %2136 = vtanh.f32 %v546_v15  ;;  %v3640_v24 = vld [vmem:[%s2568_s30 + $0x500] sm:$0xff]  ;;  %v553_v57 = vmul.f32 2.5, %v3633_v22 }
  0xd4   : > { %v2119_v43 = vpop.eup %2118  ;;  %1556 = vst [vmem:[%s2667_s17 + $0x450] sm:$0xff] %v1300_v34  ;;  %v1302_v44 = vmin.f32 %v1046_v35, %v3500_v26  ;;  %v1048_v45 = vmul.f32 %v2117_v38, %v3514_v30  ;;  %2138 = vtanh.f32 %v547_v23  ;;  %v3647_v26 = vld [vmem:[%s2568_s30 + $0x508] sm:$0xff]  ;;  %v554_v62 = vmul.f32 2.5, %v3640_v24 }
  0xd5   : > { %v2121_v48 = vpop.eup %2120  ;;  %1557 = vst [vmem:[%s2667_s17 + $0x458] sm:$0xff] %v1301_v39  ;;  %v1303_v49 = vmin.f32 %v1047_v40, %v3507_v28  ;;  %v1049_v50 = vmul.f32 %v2119_v43, %v3521_v33  ;;  %2140 = vtanh.f32 %v548_v31  ;;  %v3654_v28 = vld [vmem:[%s2568_s30 + $0x510] sm:$0xff]  ;;  %v555_v3 = vmul.f32 2.5, %v3647_v26 }
  0xd6   : > { %v2123_v53 = vpop.eup %2122  ;;  %1558 = vst [vmem:[%s2667_s17 + $0x460] sm:$0xff] %v1302_v44  ;;  %v1304_v54 = vmin.f32 %v1048_v45, %v3514_v30  ;;  %v1050_v55 = vmul.f32 %v2121_v48, %v3528_v37  ;;  %2142 = vtanh.f32 %v549_v36  ;;  %v3661_v30 = vld [vmem:[%s2568_s30 + $0x518] sm:$0xff]  ;;  %v556_v9 = vmul.f32 2.5, %v3654_v28 }
  0xd7   : > { %v2125_v58 = vpop.eup %2124  ;;  %1559 = vst [vmem:[%s2667_s17 + $0x468] sm:$0xff] %v1303_v49  ;;  %v1305_v59 = vmin.f32 %v1049_v50, %v3521_v33  ;;  %v1051_v60 = vmul.f32 %v2123_v53, %v3535_v41  ;;  %2144 = vtanh.f32 %v550_v42  ;;  %v3668_v33 = vld [vmem:[%s2568_s30 + $0x520] sm:$0xff]  ;;  %v557_v17 = vmul.f32 2.5, %v3661_v30 }
  0xd8   : > { %v2127_v63 = vpop.eup %2126  ;;  %1560 = vst [vmem:[%s2667_s17 + $0x470] sm:$0xff] %v1304_v54  ;;  %v1306_v0 = vmin.f32 %v1050_v55, %v3528_v37  ;;  %v1052_v1 = vmul.f32 %v2125_v58, %v3542_v46  ;;  %2146 = vtanh.f32 %v551_v47  ;;  %v3675_v37 = vld [vmem:[%s2568_s30 + $0x528] sm:$0xff]  ;;  %v558_v25 = vmul.f32 2.5, %v3668_v33 }
  0xd9   : > { %v2129_v4 = vpop.eup %2128  ;;  %1561 = vst [vmem:[%s2667_s17 + $0x478] sm:$0xff] %v1305_v59  ;;  %v1307_v5 = vmin.f32 %v1051_v60, %v3535_v41  ;;  %v1053_v6 = vmul.f32 %v2127_v63, %v3549_v51  ;;  %2148 = vtanh.f32 %v552_v52  ;;  %v3682_v41 = vld [vmem:[%s2568_s30 + $0x530] sm:$0xff]  ;;  %v559_v32 = vmul.f32 2.5, %v3675_v37 }
  0xda   : > { %v2131_v11 = vpop.eup %2130  ;;  %1562 = vst [vmem:[%s2667_s17 + $0x480] sm:$0xff] %v1306_v0  ;;  %v1308_v13 = vmin.f32 %v1052_v1, %v3542_v46  ;;  %v1054_v15 = vmul.f32 %v2129_v4, %v3556_v56  ;;  %2150 = vtanh.f32 %v553_v57  ;;  %v3689_v46 = vld [vmem:[%s2568_s30 + $0x538] sm:$0xff]  ;;  %v560_v38 = vmul.f32 2.5, %v3682_v41 }
  0xdb   : > { %v2133_v19 = vpop.eup %2132  ;;  %1563 = vst [vmem:[%s2667_s17 + $0x488] sm:$0xff] %v1307_v5  ;;  %v1309_v21 = vmin.f32 %v1053_v6, %v3549_v51  ;;  %v1055_v23 = vmul.f32 %v2131_v11, %v3563_v61  ;;  %2152 = vtanh.f32 %v554_v62  ;;  %v3696_v51 = vld [vmem:[%s2568_s30 + $0x540] sm:$0xff]  ;;  %v561_v43 = vmul.f32 2.5, %v3689_v46 }
  0xdc   : > { %v2135_v27 = vpop.eup %2134  ;;  %1564 = vst [vmem:[%s2667_s17 + $0x490] sm:$0xff] %v1308_v13  ;;  %v1310_v29 = vmin.f32 %v1054_v15, %v3556_v56  ;;  %v1056_v31 = vmul.f32 %v2133_v19, %v3570_v2  ;;  %2154 = vtanh.f32 %v555_v3  ;;  %v3703_v56 = vld [vmem:[%s2568_s30 + $0x548] sm:$0xff]  ;;  %v562_v48 = vmul.f32 2.5, %v3696_v51 }
  0xdd   : > { %v2137_v34 = vpop.eup %2136  ;;  %1565 = vst [vmem:[%s2667_s17 + $0x498] sm:$0xff] %v1309_v21  ;;  %v1311_v35 = vmin.f32 %v1055_v23, %v3563_v61  ;;  %v1057_v36 = vmul.f32 %v2135_v27, %v3577_v7  ;;  %2156 = vtanh.f32 %v556_v9  ;;  %v3710_v61 = vld [vmem:[%s2568_s30 + $0x550] sm:$0xff]  ;;  %v563_v53 = vmul.f32 2.5, %v3703_v56 }
  0xde   : > { %v2139_v39 = vpop.eup %2138  ;;  %1566 = vst [vmem:[%s2667_s17 + $0x4a0] sm:$0xff] %v1310_v29  ;;  %v1312_v40 = vmin.f32 %v1056_v31, %v3570_v2  ;;  %v1058_v42 = vmul.f32 %v2137_v34, %v3584_v8  ;;  %2158 = vtanh.f32 %v557_v17  ;;  %v3717_v2 = vld [vmem:[%s2568_s30 + $0x558] sm:$0xff]  ;;  %v564_v58 = vmul.f32 2.5, %v3710_v61 }
  0xdf   : > { %v2141_v44 = vpop.eup %2140  ;;  %1567 = vst [vmem:[%s2667_s17 + $0x4a8] sm:$0xff] %v1311_v35  ;;  %v1313_v45 = vmin.f32 %v1057_v36, %v3577_v7  ;;  %v1059_v47 = vmul.f32 %v2139_v39, %v3591_v10  ;;  %2160 = vtanh.f32 %v558_v25  ;;  %v3724_v7 = vld [vmem:[%s2568_s30 + $0x560] sm:$0xff]  ;;  %v565_v63 = vmul.f32 2.5, %v3717_v2 }
  0xe0   : > { %v2143_v49 = vpop.eup %2142  ;;  %1568 = vst [vmem:[%s2667_s17 + $0x4b0] sm:$0xff] %v1312_v40  ;;  %v1314_v50 = vmin.f32 %v1058_v42, %v3584_v8  ;;  %v1060_v52 = vmul.f32 %v2141_v44, %v3598_v12  ;;  %2162 = vtanh.f32 %v559_v32  ;;  %v3731_v8 = vld [vmem:[%s2568_s30 + $0x568] sm:$0xff]  ;;  %v566_v4 = vmul.f32 2.5, %v3724_v7 }
  0xe1   : > { %v2145_v54 = vpop.eup %2144  ;;  %1569 = vst [vmem:[%s2667_s17 + $0x4b8] sm:$0xff] %v1313_v45  ;;  %v1315_v55 = vmin.f32 %v1059_v47, %v3591_v10  ;;  %v1061_v57 = vmul.f32 %v2143_v49, %v3605_v14  ;;  %2164 = vtanh.f32 %v560_v38  ;;  %v3738_v10 = vld [vmem:[%s2568_s30 + $0x570] sm:$0xff]  ;;  %v567_v11 = vmul.f32 2.5, %v3731_v8 }
  0xe2   : > { %v2147_v59 = vpop.eup %2146  ;;  %1570 = vst [vmem:[%s2667_s17 + $0x4c0] sm:$0xff] %v1314_v50  ;;  %v1316_v60 = vmin.f32 %v1060_v52, %v3598_v12  ;;  %v1062_v62 = vmul.f32 %v2145_v54, %v3612_v16  ;;  %2166 = vtanh.f32 %v561_v43  ;;  %v3745_v12 = vld [vmem:[%s2568_s30 + $0x578] sm:$0xff]  ;;  %v568_v19 = vmul.f32 2.5, %v3738_v10 }
  0xe3   : > { %v2149_v0 = vpop.eup %2148  ;;  %1571 = vst [vmem:[%s2667_s17 + $0x4c8] sm:$0xff] %v1315_v55  ;;  %v1317_v1 = vmin.f32 %v1061_v57, %v3605_v14  ;;  %v1063_v3 = vmul.f32 %v2147_v59, %v3619_v18  ;;  %2168 = vtanh.f32 %v562_v48  ;;  %v3752_v14 = vld [vmem:[%s2568_s30 + $0x580] sm:$0xff]  ;;  %v569_v27 = vmul.f32 2.5, %v3745_v12 }
  0xe4   : > { %v2151_v5 = vpop.eup %2150  ;;  %1572 = vst [vmem:[%s2667_s17 + $0x4d0] sm:$0xff] %v1316_v60  ;;  %v1318_v6 = vmin.f32 %v1062_v62, %v3612_v16  ;;  %v1064_v9 = vmul.f32 %v2149_v0, %v3626_v20  ;;  %2170 = vtanh.f32 %v563_v53  ;;  %v3759_v16 = vld [vmem:[%s2568_s30 + $0x588] sm:$0xff]  ;;  %v570_v34 = vmul.f32 2.5, %v3752_v14 }
  0xe5   : > { %v2153_v13 = vpop.eup %2152  ;;  %1573 = vst [vmem:[%s2667_s17 + $0x4d8] sm:$0xff] %v1317_v1  ;;  %v1319_v15 = vmin.f32 %v1063_v3, %v3619_v18  ;;  %v1065_v17 = vmul.f32 %v2151_v5, %v3633_v22  ;;  %2172 = vtanh.f32 %v564_v58  ;;  %v3766_v18 = vld [vmem:[%s2568_s30 + $0x590] sm:$0xff]  ;;  %v571_v39 = vmul.f32 2.5, %v3759_v16 }
  0xe6   : > { %v2155_v21 = vpop.eup %2154  ;;  %1574 = vst [vmem:[%s2667_s17 + $0x4e0] sm:$0xff] %v1318_v6  ;;  %v1320_v23 = vmin.f32 %v1064_v9, %v3626_v20  ;;  %v1066_v25 = vmul.f32 %v2153_v13, %v3640_v24  ;;  %2174 = vtanh.f32 %v565_v63  ;;  %v3773_v20 = vld [vmem:[%s2568_s30 + $0x598] sm:$0xff]  ;;  %v572_v44 = vmul.f32 2.5, %v3766_v18 }
  0xe7   : > { %v2157_v29 = vpop.eup %2156  ;;  %1575 = vst [vmem:[%s2667_s17 + $0x4e8] sm:$0xff] %v1319_v15  ;;  %v1321_v31 = vmin.f32 %v1065_v17, %v3633_v22  ;;  %v1067_v32 = vmul.f32 %v2155_v21, %v3647_v26  ;;  %2176 = vtanh.f32 %v566_v4  ;;  %v3780_v22 = vld [vmem:[%s2568_s30 + $0x5a0] sm:$0xff]  ;;  %v573_v49 = vmul.f32 2.5, %v3773_v20 }
  0xe8   : > { %v2159_v35 = vpop.eup %2158  ;;  %1576 = vst [vmem:[%s2667_s17 + $0x4f0] sm:$0xff] %v1320_v23  ;;  %v1322_v36 = vmin.f32 %v1066_v25, %v3640_v24  ;;  %v1068_v38 = vmul.f32 %v2157_v29, %v3654_v28  ;;  %2178 = vtanh.f32 %v567_v11  ;;  %v3787_v24 = vld [vmem:[%s2568_s30 + $0x5a8] sm:$0xff]  ;;  %v574_v54 = vmul.f32 2.5, %v3780_v22 }
  0xe9   : > { %v2161_v40 = vpop.eup %2160  ;;  %1577 = vst [vmem:[%s2667_s17 + $0x4f8] sm:$0xff] %v1321_v31  ;;  %v1323_v42 = vmin.f32 %v1067_v32, %v3647_v26  ;;  %v1069_v43 = vmul.f32 %v2159_v35, %v3661_v30  ;;  %2180 = vtanh.f32 %v568_v19  ;;  %v3794_v26 = vld [vmem:[%s2568_s30 + $0x5b0] sm:$0xff]  ;;  %v575_v59 = vmul.f32 2.5, %v3787_v24 }
  0xea   : > { %v2163_v45 = vpop.eup %2162  ;;  %1578 = vst [vmem:[%s2667_s17 + $0x500] sm:$0xff] %v1322_v36  ;;  %v1324_v47 = vmin.f32 %v1068_v38, %v3654_v28  ;;  %v1070_v48 = vmul.f32 %v2161_v40, %v3668_v33  ;;  %2182 = vtanh.f32 %v569_v27  ;;  %v3801_v28 = vld [vmem:[%s2568_s30 + $0x5b8] sm:$0xff]  ;;  %v576_v0 = vmul.f32 2.5, %v3794_v26 }
  0xeb   : > { %v2165_v50 = vpop.eup %2164  ;;  %1579 = vst [vmem:[%s2667_s17 + $0x508] sm:$0xff] %v1323_v42  ;;  %v1325_v52 = vmin.f32 %v1069_v43, %v3661_v30  ;;  %v1071_v53 = vmul.f32 %v2163_v45, %v3675_v37  ;;  %2184 = vtanh.f32 %v570_v34  ;;  %v3808_v30 = vld [vmem:[%s2568_s30 + $0x5c0] sm:$0xff]  ;;  %v577_v5 = vmul.f32 2.5, %v3801_v28 }
  0xec   : > { %v2167_v55 = vpop.eup %2166  ;;  %1580 = vst [vmem:[%s2667_s17 + $0x510] sm:$0xff] %v1324_v47  ;;  %v1326_v57 = vmin.f32 %v1070_v48, %v3668_v33  ;;  %v1072_v58 = vmul.f32 %v2165_v50, %v3682_v41  ;;  %2186 = vtanh.f32 %v571_v39  ;;  %v3815_v33 = vld [vmem:[%s2568_s30 + $0x5c8] sm:$0xff]  ;;  %v578_v13 = vmul.f32 2.5, %v3808_v30 }
  0xed   : > { %v2169_v60 = vpop.eup %2168  ;;  %1581 = vst [vmem:[%s2667_s17 + $0x518] sm:$0xff] %v1325_v52  ;;  %v1327_v62 = vmin.f32 %v1071_v53, %v3675_v37  ;;  %v1073_v63 = vmul.f32 %v2167_v55, %v3689_v46  ;;  %2188 = vtanh.f32 %v572_v44  ;;  %v3822_v37 = vld [vmem:[%s2568_s30 + $0x5d0] sm:$0xff]  ;;  %v579_v21 = vmul.f32 2.5, %v3815_v33 }
  0xee   : > { %v2171_v1 = vpop.eup %2170  ;;  %1582 = vst [vmem:[%s2667_s17 + $0x520] sm:$0xff] %v1326_v57  ;;  %v1328_v3 = vmin.f32 %v1072_v58, %v3682_v41  ;;  %v1074_v4 = vmul.f32 %v2169_v60, %v3696_v51  ;;  %2190 = vtanh.f32 %v573_v49  ;;  %v3829_v41 = vld [vmem:[%s2568_s30 + $0x5d8] sm:$0xff]  ;;  %v580_v29 = vmul.f32 2.5, %v3822_v37 }
  0xef   : > { %v2173_v6 = vpop.eup %2172  ;;  %1583 = vst [vmem:[%s2667_s17 + $0x528] sm:$0xff] %v1327_v62  ;;  %v1329_v9 = vmin.f32 %v1073_v63, %v3689_v46  ;;  %v1075_v11 = vmul.f32 %v2171_v1, %v3703_v56  ;;  %2192 = vtanh.f32 %v574_v54  ;;  %v3836_v46 = vld [vmem:[%s2568_s30 + $0x5e0] sm:$0xff]  ;;  %v581_v35 = vmul.f32 2.5, %v3829_v41 }
  0xf0   : > { %v2175_v15 = vpop.eup %2174  ;;  %1584 = vst [vmem:[%s2667_s17 + $0x530] sm:$0xff] %v1328_v3  ;;  %v1330_v17 = vmin.f32 %v1074_v4, %v3696_v51  ;;  %v1076_v19 = vmul.f32 %v2173_v6, %v3710_v61  ;;  %2194 = vtanh.f32 %v575_v59  ;;  %v3843_v51 = vld [vmem:[%s2568_s30 + $0x5e8] sm:$0xff]  ;;  %v582_v40 = vmul.f32 2.5, %v3836_v46 }
  0xf1   : > { %v2177_v23 = vpop.eup %2176  ;;  %1585 = vst [vmem:[%s2667_s17 + $0x538] sm:$0xff] %v1329_v9  ;;  %v1331_v25 = vmin.f32 %v1075_v11, %v3703_v56  ;;  %v1077_v27 = vmul.f32 %v2175_v15, %v3717_v2  ;;  %2196 = vtanh.f32 %v576_v0  ;;  %v3850_v56 = vld [vmem:[%s2568_s30 + $0x5f0] sm:$0xff]  ;;  %v583_v45 = vmul.f32 2.5, %v3843_v51 }
  0xf2   : > { %v2179_v31 = vpop.eup %2178  ;;  %1586 = vst [vmem:[%s2667_s17 + $0x540] sm:$0xff] %v1330_v17  ;;  %v1332_v32 = vmin.f32 %v1076_v19, %v3710_v61  ;;  %v1078_v34 = vmul.f32 %v2177_v23, %v3724_v7  ;;  %2198 = vtanh.f32 %v577_v5  ;;  %v3857_v61 = vld [vmem:[%s2568_s30 + $0x5f8] sm:$0xff]  ;;  %v584_v50 = vmul.f32 2.5, %v3850_v56 }
  0xf3   : > { %v2181_v36 = vpop.eup %2180  ;;  %1587 = vst [vmem:[%s2667_s17 + $0x548] sm:$0xff] %v1331_v25  ;;  %v1333_v38 = vmin.f32 %v1077_v27, %v3717_v2  ;;  %v1079_v39 = vmul.f32 %v2179_v31, %v3731_v8  ;;  %2200 = vtanh.f32 %v578_v13  ;;  %v3864_v2 = vld [vmem:[%s2568_s30 + $0x600] sm:$0xff]  ;;  %v585_v55 = vmul.f32 2.5, %v3857_v61 }
  0xf4   : > { %v2183_v42 = vpop.eup %2182  ;;  %1588 = vst [vmem:[%s2667_s17 + $0x550] sm:$0xff] %v1332_v32  ;;  %v1334_v43 = vmin.f32 %v1078_v34, %v3724_v7  ;;  %v1080_v44 = vmul.f32 %v2181_v36, %v3738_v10  ;;  %2202 = vtanh.f32 %v579_v21  ;;  %v3871_v7 = vld [vmem:[%s2568_s30 + $0x608] sm:$0xff]  ;;  %v586_v60 = vmul.f32 2.5, %v3864_v2 }
  0xf5   : > { %v2185_v47 = vpop.eup %2184  ;;  %1589 = vst [vmem:[%s2667_s17 + $0x558] sm:$0xff] %v1333_v38  ;;  %v1335_v48 = vmin.f32 %v1079_v39, %v3731_v8  ;;  %v1081_v49 = vmul.f32 %v2183_v42, %v3745_v12  ;;  %2204 = vtanh.f32 %v580_v29  ;;  %v3878_v8 = vld [vmem:[%s2568_s30 + $0x610] sm:$0xff]  ;;  %v587_v1 = vmul.f32 2.5, %v3871_v7 }
  0xf6   : > { %v2187_v52 = vpop.eup %2186  ;;  %1590 = vst [vmem:[%s2667_s17 + $0x560] sm:$0xff] %v1334_v43  ;;  %v1336_v53 = vmin.f32 %v1080_v44, %v3738_v10  ;;  %v1082_v54 = vmul.f32 %v2185_v47, %v3752_v14  ;;  %2206 = vtanh.f32 %v581_v35  ;;  %v3885_v10 = vld [vmem:[%s2568_s30 + $0x618] sm:$0xff]  ;;  %v588_v6 = vmul.f32 2.5, %v3878_v8 }
  0xf7   : > { %v2189_v57 = vpop.eup %2188  ;;  %1591 = vst [vmem:[%s2667_s17 + $0x568] sm:$0xff] %v1335_v48  ;;  %v1337_v58 = vmin.f32 %v1081_v49, %v3745_v12  ;;  %v1083_v59 = vmul.f32 %v2187_v52, %v3759_v16  ;;  %2208 = vtanh.f32 %v582_v40  ;;  %v3892_v12 = vld [vmem:[%s2568_s30 + $0x620] sm:$0xff]  ;;  %v589_v15 = vmul.f32 2.5, %v3885_v10 }
  0xf8   : > { %v2191_v62 = vpop.eup %2190  ;;  %1592 = vst [vmem:[%s2667_s17 + $0x570] sm:$0xff] %v1336_v53  ;;  %v1338_v63 = vmin.f32 %v1082_v54, %v3752_v14  ;;  %v1084_v0 = vmul.f32 %v2189_v57, %v3766_v18  ;;  %2210 = vtanh.f32 %v583_v45  ;;  %v3899_v14 = vld [vmem:[%s2568_s30 + $0x628] sm:$0xff]  ;;  %v590_v23 = vmul.f32 2.5, %v3892_v12 }
  0xf9   : > { %v2193_v3 = vpop.eup %2192  ;;  %1593 = vst [vmem:[%s2667_s17 + $0x578] sm:$0xff] %v1337_v58  ;;  %v1339_v4 = vmin.f32 %v1083_v59, %v3759_v16  ;;  %v1085_v5 = vmul.f32 %v2191_v62, %v3773_v20  ;;  %2212 = vtanh.f32 %v584_v50  ;;  %v3906_v16 = vld [vmem:[%s2568_s30 + $0x630] sm:$0xff]  ;;  %v591_v31 = vmul.f32 2.5, %v3899_v14 }
  0xfa   : > { %v2195_v9 = vpop.eup %2194  ;;  %1594 = vst [vmem:[%s2667_s17 + $0x580] sm:$0xff] %v1338_v63  ;;  %v1340_v11 = vmin.f32 %v1084_v0, %v3766_v18  ;;  %v1086_v13 = vmul.f32 %v2193_v3, %v3780_v22  ;;  %2214 = vtanh.f32 %v585_v55  ;;  %v3913_v18 = vld [vmem:[%s2568_s30 + $0x638] sm:$0xff]  ;;  %v592_v36 = vmul.f32 2.5, %v3906_v16 }
  0xfb   : > { %v2197_v17 = vpop.eup %2196  ;;  %1595 = vst [vmem:[%s2667_s17 + $0x588] sm:$0xff] %v1339_v4  ;;  %v1341_v19 = vmin.f32 %v1085_v5, %v3773_v20  ;;  %v1087_v21 = vmul.f32 %v2195_v9, %v3787_v24  ;;  %2216 = vtanh.f32 %v586_v60  ;;  %v3920_v20 = vld [vmem:[%s2568_s30 + $0x640] sm:$0xff]  ;;  %v593_v42 = vmul.f32 2.5, %v3913_v18 }
  0xfc   : > { %v2199_v25 = vpop.eup %2198  ;;  %1596 = vst [vmem:[%s2667_s17 + $0x590] sm:$0xff] %v1340_v11  ;;  %v1342_v27 = vmin.f32 %v1086_v13, %v3780_v22  ;;  %v1088_v29 = vmul.f32 %v2197_v17, %v3794_v26  ;;  %2218 = vtanh.f32 %v587_v1  ;;  %v3927_v22 = vld [vmem:[%s2568_s30 + $0x648] sm:$0xff]  ;;  %v594_v47 = vmul.f32 2.5, %v3920_v20 }
  0xfd   : > { %v2201_v32 = vpop.eup %2200  ;;  %1597 = vst [vmem:[%s2667_s17 + $0x598] sm:$0xff] %v1341_v19  ;;  %v1343_v34 = vmin.f32 %v1087_v21, %v3787_v24  ;;  %v1089_v35 = vmul.f32 %v2199_v25, %v3801_v28  ;;  %2220 = vtanh.f32 %v588_v6  ;;  %v3934_v24 = vld [vmem:[%s2568_s30 + $0x650] sm:$0xff]  ;;  %v595_v52 = vmul.f32 2.5, %v3927_v22 }
  0xfe   : > { %v2203_v38 = vpop.eup %2202  ;;  %1598 = vst [vmem:[%s2667_s17 + $0x5a0] sm:$0xff] %v1342_v27  ;;  %v1344_v39 = vmin.f32 %v1088_v29, %v3794_v26  ;;  %v1090_v40 = vmul.f32 %v2201_v32, %v3808_v30  ;;  %2222 = vtanh.f32 %v589_v15  ;;  %v3941_v26 = vld [vmem:[%s2568_s30 + $0x658] sm:$0xff]  ;;  %v596_v57 = vmul.f32 2.5, %v3934_v24 }
  0xff   : > { %v2205_v43 = vpop.eup %2204  ;;  %1599 = vst [vmem:[%s2667_s17 + $0x5a8] sm:$0xff] %v1343_v34  ;;  %v1345_v44 = vmin.f32 %v1089_v35, %v3801_v28  ;;  %v1091_v45 = vmul.f32 %v2203_v38, %v3815_v33  ;;  %2224 = vtanh.f32 %v590_v23  ;;  %v3948_v28 = vld [vmem:[%s2568_s30 + $0x660] sm:$0xff]  ;;  %v597_v62 = vmul.f32 2.5, %v3941_v26 }
 0x100   : > { %v2207_v48 = vpop.eup %2206  ;;  %1600 = vst [vmem:[%s2667_s17 + $0x5b0] sm:$0xff] %v1344_v39  ;;  %v1346_v49 = vmin.f32 %v1090_v40, %v3808_v30  ;;  %v1092_v50 = vmul.f32 %v2205_v43, %v3822_v37  ;;  %2226 = vtanh.f32 %v591_v31  ;;  %v3955_v30 = vld [vmem:[%s2568_s30 + $0x668] sm:$0xff]  ;;  %v598_v3 = vmul.f32 2.5, %v3948_v28 }
 0x101   : > { %v2209_v53 = vpop.eup %2208  ;;  %1601 = vst [vmem:[%s2667_s17 + $0x5b8] sm:$0xff] %v1345_v44  ;;  %v1347_v54 = vmin.f32 %v1091_v45, %v3815_v33  ;;  %v1093_v55 = vmul.f32 %v2207_v48, %v3829_v41  ;;  %2228 = vtanh.f32 %v592_v36  ;;  %v3962_v33 = vld [vmem:[%s2568_s30 + $0x670] sm:$0xff]  ;;  %v599_v9 = vmul.f32 2.5, %v3955_v30 }
 0x102   : > { %v2211_v58 = vpop.eup %2210  ;;  %1602 = vst [vmem:[%s2667_s17 + $0x5c0] sm:$0xff] %v1346_v49  ;;  %v1348_v59 = vmin.f32 %v1092_v50, %v3822_v37  ;;  %v1094_v60 = vmul.f32 %v2209_v53, %v3836_v46  ;;  %2230 = vtanh.f32 %v593_v42  ;;  %v3969_v37 = vld [vmem:[%s2568_s30 + $0x678] sm:$0xff]  ;;  %v600_v17 = vmul.f32 2.5, %v3962_v33 }
 0x103   : > { %v2213_v63 = vpop.eup %2212  ;;  %1603 = vst [vmem:[%s2667_s17 + $0x5c8] sm:$0xff] %v1347_v54  ;;  %v1349_v0 = vmin.f32 %v1093_v55, %v3829_v41  ;;  %v1095_v1 = vmul.f32 %v2211_v58, %v3843_v51  ;;  %2232 = vtanh.f32 %v594_v47  ;;  %v3976_v41 = vld [vmem:[%s2568_s30 + $0x680] sm:$0xff]  ;;  %v601_v25 = vmul.f32 2.5, %v3969_v37 }
 0x104   : > { %v2215_v4 = vpop.eup %2214  ;;  %1604 = vst [vmem:[%s2667_s17 + $0x5d0] sm:$0xff] %v1348_v59  ;;  %v1350_v5 = vmin.f32 %v1094_v60, %v3836_v46  ;;  %v1096_v6 = vmul.f32 %v2213_v63, %v3850_v56  ;;  %2234 = vtanh.f32 %v595_v52  ;;  %v3983_v46 = vld [vmem:[%s2568_s30 + $0x688] sm:$0xff]  ;;  %v602_v32 = vmul.f32 2.5, %v3976_v41 }
 0x105   : > { %v2217_v11 = vpop.eup %2216  ;;  %1605 = vst [vmem:[%s2667_s17 + $0x5d8] sm:$0xff] %v1349_v0  ;;  %v1351_v13 = vmin.f32 %v1095_v1, %v3843_v51  ;;  %v1097_v15 = vmul.f32 %v2215_v4, %v3857_v61  ;;  %2236 = vtanh.f32 %v596_v57  ;;  %v3990_v51 = vld [vmem:[%s2568_s30 + $0x690] sm:$0xff]  ;;  %v603_v38 = vmul.f32 2.5, %v3983_v46 }
 0x106   : > { %v2219_v19 = vpop.eup %2218  ;;  %1606 = vst [vmem:[%s2667_s17 + $0x5e0] sm:$0xff] %v1350_v5  ;;  %v1352_v21 = vmin.f32 %v1096_v6, %v3850_v56  ;;  %v1098_v23 = vmul.f32 %v2217_v11, %v3864_v2  ;;  %2238 = vtanh.f32 %v597_v62  ;;  %v3997_v56 = vld [vmem:[%s2568_s30 + $0x698] sm:$0xff]  ;;  %v604_v43 = vmul.f32 2.5, %v3990_v51 }
 0x107   : > { %v2221_v27 = vpop.eup %2220  ;;  %1607 = vst [vmem:[%s2667_s17 + $0x5e8] sm:$0xff] %v1351_v13  ;;  %v1353_v29 = vmin.f32 %v1097_v15, %v3857_v61  ;;  %v1099_v31 = vmul.f32 %v2219_v19, %v3871_v7  ;;  %2240 = vtanh.f32 %v598_v3  ;;  %v4004_v61 = vld [vmem:[%s2568_s30 + $0x6a0] sm:$0xff]  ;;  %v605_v48 = vmul.f32 2.5, %v3997_v56 }
 0x108   : > { %v2223_v34 = vpop.eup %2222  ;;  %1608 = vst [vmem:[%s2667_s17 + $0x5f0] sm:$0xff] %v1352_v21  ;;  %v1354_v35 = vmin.f32 %v1098_v23, %v3864_v2  ;;  %v1100_v36 = vmul.f32 %v2221_v27, %v3878_v8  ;;  %2242 = vtanh.f32 %v599_v9  ;;  %v4011_v2 = vld [vmem:[%s2568_s30 + $0x6a8] sm:$0xff]  ;;  %v606_v53 = vmul.f32 2.5, %v4004_v61 }
 0x109   : > { %v2225_v39 = vpop.eup %2224  ;;  %1609 = vst [vmem:[%s2667_s17 + $0x5f8] sm:$0xff] %v1353_v29  ;;  %v1355_v40 = vmin.f32 %v1099_v31, %v3871_v7  ;;  %v1101_v42 = vmul.f32 %v2223_v34, %v3885_v10  ;;  %2244 = vtanh.f32 %v600_v17  ;;  %v4018_v7 = vld [vmem:[%s2568_s30 + $0x6b0] sm:$0xff]  ;;  %v607_v58 = vmul.f32 2.5, %v4011_v2 }
 0x10a   : > { %v2227_v44 = vpop.eup %2226  ;;  %1610 = vst [vmem:[%s2667_s17 + $0x600] sm:$0xff] %v1354_v35  ;;  %v1356_v45 = vmin.f32 %v1100_v36, %v3878_v8  ;;  %v1102_v47 = vmul.f32 %v2225_v39, %v3892_v12  ;;  %2246 = vtanh.f32 %v601_v25  ;;  %v4025_v8 = vld [vmem:[%s2568_s30 + $0x6b8] sm:$0xff]  ;;  %v608_v63 = vmul.f32 2.5, %v4018_v7 }
 0x10b   : > { %v2229_v49 = vpop.eup %2228  ;;  %1611 = vst [vmem:[%s2667_s17 + $0x608] sm:$0xff] %v1355_v40  ;;  %v1357_v50 = vmin.f32 %v1101_v42, %v3885_v10  ;;  %v1103_v52 = vmul.f32 %v2227_v44, %v3899_v14  ;;  %2248 = vtanh.f32 %v602_v32  ;;  %v4032_v10 = vld [vmem:[%s2568_s30 + $0x6c0] sm:$0xff]  ;;  %v609_v4 = vmul.f32 2.5, %v4025_v8 }
 0x10c   : > { %v2231_v54 = vpop.eup %2230  ;;  %1612 = vst [vmem:[%s2667_s17 + $0x610] sm:$0xff] %v1356_v45  ;;  %v1358_v55 = vmin.f32 %v1102_v47, %v3892_v12  ;;  %v1104_v57 = vmul.f32 %v2229_v49, %v3906_v16  ;;  %2250 = vtanh.f32 %v603_v38  ;;  %v4039_v12 = vld [vmem:[%s2568_s30 + $0x6c8] sm:$0xff]  ;;  %v610_v11 = vmul.f32 2.5, %v4032_v10 }
 0x10d   : > { %v2233_v59 = vpop.eup %2232  ;;  %1613 = vst [vmem:[%s2667_s17 + $0x618] sm:$0xff] %v1357_v50  ;;  %v1359_v60 = vmin.f32 %v1103_v52, %v3899_v14  ;;  %v1105_v62 = vmul.f32 %v2231_v54, %v3913_v18  ;;  %2252 = vtanh.f32 %v604_v43  ;;  %v4046_v14 = vld [vmem:[%s2568_s30 + $0x6d0] sm:$0xff]  ;;  %v611_v19 = vmul.f32 2.5, %v4039_v12 }
 0x10e   : > { %v2235_v0 = vpop.eup %2234  ;;  %1614 = vst [vmem:[%s2667_s17 + $0x620] sm:$0xff] %v1358_v55  ;;  %v1360_v1 = vmin.f32 %v1104_v57, %v3906_v16  ;;  %v1106_v3 = vmul.f32 %v2233_v59, %v3920_v20  ;;  %2254 = vtanh.f32 %v605_v48  ;;  %v4053_v16 = vld [vmem:[%s2568_s30 + $0x6d8] sm:$0xff]  ;;  %v612_v27 = vmul.f32 2.5, %v4046_v14 }
 0x10f   : > { %v2237_v5 = vpop.eup %2236  ;;  %1615 = vst [vmem:[%s2667_s17 + $0x628] sm:$0xff] %v1359_v60  ;;  %v1361_v6 = vmin.f32 %v1105_v62, %v3913_v18  ;;  %v1107_v9 = vmul.f32 %v2235_v0, %v3927_v22  ;;  %2256 = vtanh.f32 %v606_v53  ;;  %v4060_v18 = vld [vmem:[%s2568_s30 + $0x6e0] sm:$0xff]  ;;  %v613_v34 = vmul.f32 2.5, %v4053_v16 }
 0x110   : > { %v2239_v13 = vpop.eup %2238  ;;  %1616 = vst [vmem:[%s2667_s17 + $0x630] sm:$0xff] %v1360_v1  ;;  %v1362_v15 = vmin.f32 %v1106_v3, %v3920_v20  ;;  %v1108_v17 = vmul.f32 %v2237_v5, %v3934_v24  ;;  %2258 = vtanh.f32 %v607_v58  ;;  %v4067_v20 = vld [vmem:[%s2568_s30 + $0x6e8] sm:$0xff]  ;;  %v614_v39 = vmul.f32 2.5, %v4060_v18 }
 0x111   : > { %v2241_v21 = vpop.eup %2240  ;;  %1617 = vst [vmem:[%s2667_s17 + $0x638] sm:$0xff] %v1361_v6  ;;  %v1363_v23 = vmin.f32 %v1107_v9, %v3927_v22  ;;  %v1109_v25 = vmul.f32 %v2239_v13, %v3941_v26  ;;  %2260 = vtanh.f32 %v608_v63  ;;  %v4074_v22 = vld [vmem:[%s2568_s30 + $0x6f0] sm:$0xff]  ;;  %v615_v44 = vmul.f32 2.5, %v4067_v20 }
 0x112   : > { %v2243_v29 = vpop.eup %2242  ;;  %1618 = vst [vmem:[%s2667_s17 + $0x640] sm:$0xff] %v1362_v15  ;;  %v1364_v31 = vmin.f32 %v1108_v17, %v3934_v24  ;;  %v1110_v32 = vmul.f32 %v2241_v21, %v3948_v28  ;;  %2262 = vtanh.f32 %v609_v4  ;;  %v4081_v24 = vld [vmem:[%s2568_s30 + $0x6f8] sm:$0xff]  ;;  %v616_v49 = vmul.f32 2.5, %v4074_v22 }
 0x113   : > { %v2245_v35 = vpop.eup %2244  ;;  %1619 = vst [vmem:[%s2667_s17 + $0x648] sm:$0xff] %v1363_v23  ;;  %v1365_v36 = vmin.f32 %v1109_v25, %v3941_v26  ;;  %v1111_v38 = vmul.f32 %v2243_v29, %v3955_v30  ;;  %2264 = vtanh.f32 %v610_v11  ;;  %v4088_v26 = vld [vmem:[%s2568_s30 + $0x700] sm:$0xff]  ;;  %v617_v54 = vmul.f32 2.5, %v4081_v24 }
 0x114   : > { %v2247_v40 = vpop.eup %2246  ;;  %1620 = vst [vmem:[%s2667_s17 + $0x650] sm:$0xff] %v1364_v31  ;;  %v1366_v42 = vmin.f32 %v1110_v32, %v3948_v28  ;;  %v1112_v43 = vmul.f32 %v2245_v35, %v3962_v33  ;;  %2266 = vtanh.f32 %v611_v19  ;;  %v4095_v28 = vld [vmem:[%s2568_s30 + $0x708] sm:$0xff]  ;;  %v618_v59 = vmul.f32 2.5, %v4088_v26 }
 0x115   : > { %v2249_v45 = vpop.eup %2248  ;;  %1621 = vst [vmem:[%s2667_s17 + $0x658] sm:$0xff] %v1365_v36  ;;  %v1367_v47 = vmin.f32 %v1111_v38, %v3955_v30  ;;  %v1113_v48 = vmul.f32 %v2247_v40, %v3969_v37  ;;  %2268 = vtanh.f32 %v612_v27  ;;  %v4102_v30 = vld [vmem:[%s2568_s30 + $0x710] sm:$0xff]  ;;  %v619_v0 = vmul.f32 2.5, %v4095_v28 }
 0x116   : > { %v2251_v50 = vpop.eup %2250  ;;  %1622 = vst [vmem:[%s2667_s17 + $0x660] sm:$0xff] %v1366_v42  ;;  %v1368_v52 = vmin.f32 %v1112_v43, %v3962_v33  ;;  %v1114_v53 = vmul.f32 %v2249_v45, %v3976_v41  ;;  %2270 = vtanh.f32 %v613_v34  ;;  %v4109_v33 = vld [vmem:[%s2568_s30 + $0x718] sm:$0xff]  ;;  %v620_v5 = vmul.f32 2.5, %v4102_v30 }
 0x117   : > { %v2253_v55 = vpop.eup %2252  ;;  %1623 = vst [vmem:[%s2667_s17 + $0x668] sm:$0xff] %v1367_v47  ;;  %v1369_v57 = vmin.f32 %v1113_v48, %v3969_v37  ;;  %v1115_v58 = vmul.f32 %v2251_v50, %v3983_v46  ;;  %2272 = vtanh.f32 %v614_v39  ;;  %v4116_v37 = vld [vmem:[%s2568_s30 + $0x720] sm:$0xff]  ;;  %v621_v13 = vmul.f32 2.5, %v4109_v33 }
 0x118   : > { %v2255_v60 = vpop.eup %2254  ;;  %1624 = vst [vmem:[%s2667_s17 + $0x670] sm:$0xff] %v1368_v52  ;;  %v1370_v62 = vmin.f32 %v1114_v53, %v3976_v41  ;;  %v1116_v63 = vmul.f32 %v2253_v55, %v3990_v51  ;;  %2274 = vtanh.f32 %v615_v44  ;;  %v4123_v41 = vld [vmem:[%s2568_s30 + $0x728] sm:$0xff]  ;;  %v622_v21 = vmul.f32 2.5, %v4116_v37 }
 0x119   : > { %v2257_v1 = vpop.eup %2256  ;;  %1625 = vst [vmem:[%s2667_s17 + $0x678] sm:$0xff] %v1369_v57  ;;  %v1371_v3 = vmin.f32 %v1115_v58, %v3983_v46  ;;  %v1117_v4 = vmul.f32 %v2255_v60, %v3997_v56  ;;  %2276 = vtanh.f32 %v616_v49  ;;  %v4130_v46 = vld [vmem:[%s2568_s30 + $0x730] sm:$0xff]  ;;  %v623_v29 = vmul.f32 2.5, %v4123_v41 }
 0x11a   : > { %v2259_v6 = vpop.eup %2258  ;;  %1626 = vst [vmem:[%s2667_s17 + $0x680] sm:$0xff] %v1370_v62  ;;  %v1372_v9 = vmin.f32 %v1116_v63, %v3990_v51  ;;  %v1118_v11 = vmul.f32 %v2257_v1, %v4004_v61  ;;  %2278 = vtanh.f32 %v617_v54  ;;  %v4137_v51 = vld [vmem:[%s2568_s30 + $0x738] sm:$0xff]  ;;  %v624_v35 = vmul.f32 2.5, %v4130_v46 }
 0x11b   : > { %v2261_v15 = vpop.eup %2260  ;;  %1627 = vst [vmem:[%s2667_s17 + $0x688] sm:$0xff] %v1371_v3  ;;  %v1373_v17 = vmin.f32 %v1117_v4, %v3997_v56  ;;  %v1119_v19 = vmul.f32 %v2259_v6, %v4011_v2  ;;  %2280 = vtanh.f32 %v618_v59  ;;  %v4144_v56 = vld [vmem:[%s2568_s30 + $0x740] sm:$0xff]  ;;  %v625_v40 = vmul.f32 2.5, %v4137_v51 }
 0x11c   : > { %v2263_v23 = vpop.eup %2262  ;;  %1628 = vst [vmem:[%s2667_s17 + $0x690] sm:$0xff] %v1372_v9  ;;  %v1374_v25 = vmin.f32 %v1118_v11, %v4004_v61  ;;  %v1120_v27 = vmul.f32 %v2261_v15, %v4018_v7  ;;  %2282 = vtanh.f32 %v619_v0  ;;  %v4151_v61 = vld [vmem:[%s2568_s30 + $0x748] sm:$0xff]  ;;  %v626_v45 = vmul.f32 2.5, %v4144_v56 }
 0x11d   : > { %v2265_v31 = vpop.eup %2264  ;;  %1629 = vst [vmem:[%s2667_s17 + $0x698] sm:$0xff] %v1373_v17  ;;  %v1375_v32 = vmin.f32 %v1119_v19, %v4011_v2  ;;  %v1121_v34 = vmul.f32 %v2263_v23, %v4025_v8  ;;  %2284 = vtanh.f32 %v620_v5  ;;  %v4158_v2 = vld [vmem:[%s2568_s30 + $0x750] sm:$0xff]  ;;  %v627_v50 = vmul.f32 2.5, %v4151_v61 }
 0x11e   : > { %v2267_v36 = vpop.eup %2266  ;;  %1630 = vst [vmem:[%s2667_s17 + $0x6a0] sm:$0xff] %v1374_v25  ;;  %v1376_v38 = vmin.f32 %v1120_v27, %v4018_v7  ;;  %v1122_v39 = vmul.f32 %v2265_v31, %v4032_v10  ;;  %2286 = vtanh.f32 %v621_v13  ;;  %v4165_v7 = vld [vmem:[%s2568_s30 + $0x758] sm:$0xff]  ;;  %v628_v55 = vmul.f32 2.5, %v4158_v2 }
 0x11f   : > { %v2269_v42 = vpop.eup %2268  ;;  %1631 = vst [vmem:[%s2667_s17 + $0x6a8] sm:$0xff] %v1375_v32  ;;  %v1377_v43 = vmin.f32 %v1121_v34, %v4025_v8  ;;  %v1123_v44 = vmul.f32 %v2267_v36, %v4039_v12  ;;  %2288 = vtanh.f32 %v622_v21  ;;  %v4172_v8 = vld [vmem:[%s2568_s30 + $0x760] sm:$0xff]  ;;  %v629_v60 = vmul.f32 2.5, %v4165_v7 }
 0x120   : > { %v2271_v47 = vpop.eup %2270  ;;  %1632 = vst [vmem:[%s2667_s17 + $0x6b0] sm:$0xff] %v1376_v38  ;;  %v1378_v48 = vmin.f32 %v1122_v39, %v4032_v10  ;;  %v1124_v49 = vmul.f32 %v2269_v42, %v4046_v14  ;;  %2290 = vtanh.f32 %v623_v29  ;;  %v4179_v10 = vld [vmem:[%s2568_s30 + $0x768] sm:$0xff]  ;;  %v630_v1 = vmul.f32 2.5, %v4172_v8 }
 0x121   : > { %v2273_v52 = vpop.eup %2272  ;;  %1633 = vst [vmem:[%s2667_s17 + $0x6b8] sm:$0xff] %v1377_v43  ;;  %v1379_v53 = vmin.f32 %v1123_v44, %v4039_v12  ;;  %v1125_v54 = vmul.f32 %v2271_v47, %v4053_v16  ;;  %2292 = vtanh.f32 %v624_v35  ;;  %v4186_v12 = vld [vmem:[%s2568_s30 + $0x770] sm:$0xff]  ;;  %v631_v6 = vmul.f32 2.5, %v4179_v10 }
 0x122   : > { %v2275_v57 = vpop.eup %2274  ;;  %1634 = vst [vmem:[%s2667_s17 + $0x6c0] sm:$0xff] %v1378_v48  ;;  %v1380_v58 = vmin.f32 %v1124_v49, %v4046_v14  ;;  %v1126_v59 = vmul.f32 %v2273_v52, %v4060_v18  ;;  %2294 = vtanh.f32 %v625_v40  ;;  %v4193_v14 = vld [vmem:[%s2568_s30 + $0x778] sm:$0xff]  ;;  %v632_v15 = vmul.f32 2.5, %v4186_v12 }
 0x123   : > { %v2277_v62 = vpop.eup %2276  ;;  %1635 = vst [vmem:[%s2667_s17 + $0x6c8] sm:$0xff] %v1379_v53  ;;  %v1381_v63 = vmin.f32 %v1125_v54, %v4053_v16  ;;  %v1127_v0 = vmul.f32 %v2275_v57, %v4067_v20  ;;  %2296 = vtanh.f32 %v626_v45  ;;  %v4200_v16 = vld [vmem:[%s2568_s30 + $0x780] sm:$0xff]  ;;  %v633_v23 = vmul.f32 2.5, %v4193_v14 }
 0x124   : > { %v2279_v3 = vpop.eup %2278  ;;  %1636 = vst [vmem:[%s2667_s17 + $0x6d0] sm:$0xff] %v1380_v58  ;;  %v1382_v4 = vmin.f32 %v1126_v59, %v4060_v18  ;;  %v1128_v5 = vmul.f32 %v2277_v62, %v4074_v22  ;;  %2298 = vtanh.f32 %v627_v50  ;;  %v4207_v18 = vld [vmem:[%s2568_s30 + $0x788] sm:$0xff]  ;;  %v634_v31 = vmul.f32 2.5, %v4200_v16 }
 0x125   : > { %v2281_v9 = vpop.eup %2280  ;;  %1637 = vst [vmem:[%s2667_s17 + $0x6d8] sm:$0xff] %v1381_v63  ;;  %v1383_v11 = vmin.f32 %v1127_v0, %v4067_v20  ;;  %v1129_v13 = vmul.f32 %v2279_v3, %v4081_v24  ;;  %2300 = vtanh.f32 %v628_v55  ;;  %v4214_v20 = vld [vmem:[%s2568_s30 + $0x790] sm:$0xff]  ;;  %v635_v36 = vmul.f32 2.5, %v4207_v18 }
 0x126   : > { %v2283_v17 = vpop.eup %2282  ;;  %1638 = vst [vmem:[%s2667_s17 + $0x6e0] sm:$0xff] %v1382_v4  ;;  %v1384_v19 = vmin.f32 %v1128_v5, %v4074_v22  ;;  %v1130_v21 = vmul.f32 %v2281_v9, %v4088_v26  ;;  %2302 = vtanh.f32 %v629_v60  ;;  %v4221_v22 = vld [vmem:[%s2568_s30 + $0x798] sm:$0xff]  ;;  %v636_v42 = vmul.f32 2.5, %v4214_v20 }
 0x127   : > { %v2285_v25 = vpop.eup %2284  ;;  %1639 = vst [vmem:[%s2667_s17 + $0x6e8] sm:$0xff] %v1383_v11  ;;  %v1385_v27 = vmin.f32 %v1129_v13, %v4081_v24  ;;  %v1131_v29 = vmul.f32 %v2283_v17, %v4095_v28  ;;  %2304 = vtanh.f32 %v630_v1  ;;  %v4228_v24 = vld [vmem:[%s2568_s30 + $0x7a0] sm:$0xff]  ;;  %v637_v47 = vmul.f32 2.5, %v4221_v22 }
 0x128   : > { %v2287_v32 = vpop.eup %2286  ;;  %1640 = vst [vmem:[%s2667_s17 + $0x6f0] sm:$0xff] %v1384_v19  ;;  %v1386_v34 = vmin.f32 %v1130_v21, %v4088_v26  ;;  %v1132_v35 = vmul.f32 %v2285_v25, %v4102_v30  ;;  %2306 = vtanh.f32 %v631_v6  ;;  %v4235_v26 = vld [vmem:[%s2568_s30 + $0x7a8] sm:$0xff]  ;;  %v638_v52 = vmul.f32 2.5, %v4228_v24 }
 0x129   : > { %v2289_v38 = vpop.eup %2288  ;;  %1641 = vst [vmem:[%s2667_s17 + $0x6f8] sm:$0xff] %v1385_v27  ;;  %v1387_v39 = vmin.f32 %v1131_v29, %v4095_v28  ;;  %v1133_v40 = vmul.f32 %v2287_v32, %v4109_v33  ;;  %2308 = vtanh.f32 %v632_v15  ;;  %v4242_v28 = vld [vmem:[%s2568_s30 + $0x7b0] sm:$0xff]  ;;  %v639_v57 = vmul.f32 2.5, %v4235_v26 }
 0x12a   : > { %v2291_v43 = vpop.eup %2290  ;;  %1642 = vst [vmem:[%s2667_s17 + $0x700] sm:$0xff] %v1386_v34  ;;  %v1388_v44 = vmin.f32 %v1132_v35, %v4102_v30  ;;  %v1134_v45 = vmul.f32 %v2289_v38, %v4116_v37  ;;  %2310 = vtanh.f32 %v633_v23  ;;  %v4249_v30 = vld [vmem:[%s2568_s30 + $0x7b8] sm:$0xff]  ;;  %v640_v62 = vmul.f32 2.5, %v4242_v28 }
 0x12b   : > { %v2293_v48 = vpop.eup %2292  ;;  %1643 = vst [vmem:[%s2667_s17 + $0x708] sm:$0xff] %v1387_v39  ;;  %v1389_v49 = vmin.f32 %v1133_v40, %v4109_v33  ;;  %v1135_v50 = vmul.f32 %v2291_v43, %v4123_v41  ;;  %2312 = vtanh.f32 %v634_v31  ;;  %v4256_v33 = vld [vmem:[%s2568_s30 + $0x7c0] sm:$0xff]  ;;  %v641_v3 = vmul.f32 2.5, %v4249_v30  ;;  %v4305_v39 = vld [vmem:[%s2568_s30 + $0x7f8] sm:$0xff] }
 0x12c   : > { %v2295_v53 = vpop.eup %2294  ;;  %1644 = vst [vmem:[%s2667_s17 + $0x710] sm:$0xff] %v1388_v44  ;;  %v1390_v54 = vmin.f32 %v1134_v45, %v4116_v37  ;;  %v1136_v55 = vmul.f32 %v2293_v48, %v4130_v46  ;;  %2314 = vtanh.f32 %v635_v36  ;;  %v4263_v37 = vld [vmem:[%s2568_s30 + $0x7c8] sm:$0xff]  ;;  %v642_v9 = vmul.f32 2.5, %v4256_v33 }
 0x12d   : > { %v2297_v58 = vpop.eup %2296  ;;  %1645 = vst [vmem:[%s2667_s17 + $0x718] sm:$0xff] %v1389_v49  ;;  %v1391_v59 = vmin.f32 %v1135_v50, %v4123_v41  ;;  %v1137_v60 = vmul.f32 %v2295_v53, %v4137_v51  ;;  %2316 = vtanh.f32 %v636_v42  ;;  %v4270_v41 = vld [vmem:[%s2568_s30 + $0x7d0] sm:$0xff]  ;;  %v643_v17 = vmul.f32 2.5, %v4263_v37 }
 0x12e   : > { %v2299_v63 = vpop.eup %2298  ;;  %1646 = vst [vmem:[%s2667_s17 + $0x720] sm:$0xff] %v1390_v54  ;;  %v1392_v0 = vmin.f32 %v1136_v55, %v4130_v46  ;;  %v1138_v1 = vmul.f32 %v2297_v58, %v4144_v56  ;;  %2318 = vtanh.f32 %v637_v47  ;;  %v4277_v46 = vld [vmem:[%s2568_s30 + $0x7d8] sm:$0xff]  ;;  %v644_v25 = vmul.f32 2.5, %v4270_v41 }
 0x12f   : > { %v2301_v4 = vpop.eup %2300  ;;  %1647 = vst [vmem:[%s2667_s17 + $0x728] sm:$0xff] %v1391_v59  ;;  %v1393_v5 = vmin.f32 %v1137_v60, %v4137_v51  ;;  %v1139_v6 = vmul.f32 %v2299_v63, %v4151_v61  ;;  %2320 = vtanh.f32 %v638_v52  ;;  %v4284_v51 = vld [vmem:[%s2568_s30 + $0x7e0] sm:$0xff]  ;;  %v645_v32 = vmul.f32 2.5, %v4277_v46 }
 0x130   : > { %v2303_v11 = vpop.eup %2302  ;;  %1648 = vst [vmem:[%s2667_s17 + $0x730] sm:$0xff] %v1392_v0  ;;  %v1394_v13 = vmin.f32 %v1138_v1, %v4144_v56  ;;  %v1140_v15 = vmul.f32 %v2301_v4, %v4158_v2  ;;  %2322 = vtanh.f32 %v639_v57  ;;  %v4291_v56 = vld [vmem:[%s2568_s30 + $0x7e8] sm:$0xff]  ;;  %v646_v38 = vmul.f32 2.5, %v4284_v51 }
 0x131   : > { %v2305_v19 = vpop.eup %2304  ;;  %1649 = vst [vmem:[%s2667_s17 + $0x738] sm:$0xff] %v1393_v5  ;;  %v1395_v21 = vmin.f32 %v1139_v6, %v4151_v61  ;;  %v1141_v23 = vmul.f32 %v2303_v11, %v4165_v7  ;;  %2324 = vtanh.f32 %v640_v62  ;;  %v4298_v61 = vld [vmem:[%s2568_s30 + $0x7f0] sm:$0xff]  ;;  %v647_v43 = vmul.f32 2.5, %v4291_v56 }
 0x132   : > { %v2307_v27 = vpop.eup %2306  ;;  %1650 = vst [vmem:[%s2667_s17 + $0x740] sm:$0xff] %v1394_v13  ;;  %v1396_v29 = vmin.f32 %v1140_v15, %v4158_v2  ;;  %v1142_v31 = vmul.f32 %v2305_v19, %v4172_v8  ;;  %2326 = vtanh.f32 %v641_v3  ;;  %v648_v47 = vmul.f32 2.5, %v4298_v61 }
 0x133   : > { %v2309_v34 = vpop.eup %2308  ;;  %1651 = vst [vmem:[%s2667_s17 + $0x748] sm:$0xff] %v1395_v21  ;;  %v1397_v35 = vmin.f32 %v1141_v23, %v4165_v7  ;;  %v1143_v36 = vmul.f32 %v2307_v27, %v4179_v10  ;;  %2328 = vtanh.f32 %v642_v9  ;;  %v649_v50 = vmul.f32 2.5, %v4305_v39 }
 0x134   : > { %v2311_v2 = vpop.eup %2310  ;;  %1652 = vst [vmem:[%s2667_s17 + $0x750] sm:$0xff] %v1396_v29  ;;  %v1398_v40 = vmin.f32 %v1142_v31, %v4172_v8  ;;  %v1144_v42 = vmul.f32 %v2309_v34, %v4186_v12  ;;  %2330 = vtanh.f32 %v643_v17 }
 0x135   : > { %v2313_v44 = vpop.eup %2312  ;;  %1653 = vst [vmem:[%s2667_s17 + $0x758] sm:$0xff] %v1397_v35  ;;  %v1399_v7 = vmin.f32 %v1143_v36, %v4179_v10  ;;  %v1145_v45 = vmul.f32 %v2311_v2, %v4193_v14  ;;  %2332 = vtanh.f32 %v644_v25 }
 0x136   : > { %v2315_v48 = vpop.eup %2314  ;;  %1654 = vst [vmem:[%s2667_s17 + $0x760] sm:$0xff] %v1398_v40  ;;  %v1400_v8 = vmin.f32 %v1144_v42, %v4186_v12  ;;  %v1146_v49 = vmul.f32 %v2313_v44, %v4200_v16  ;;  %2334 = vtanh.f32 %v645_v32 }
 0x137   : > { %v2317_v52 = vpop.eup %2316  ;;  %1655 = vst [vmem:[%s2667_s17 + $0x768] sm:$0xff] %v1399_v7  ;;  %v1401_v10 = vmin.f32 %v1145_v45, %v4193_v14  ;;  %v1147_v53 = vmul.f32 %v2315_v48, %v4207_v18  ;;  %2336 = vtanh.f32 %v646_v38 }
 0x138   : > { %v2319_v54 = vpop.eup %2318  ;;  %1656 = vst [vmem:[%s2667_s17 + $0x770] sm:$0xff] %v1400_v8  ;;  %v1402_v55 = vmin.f32 %v1146_v49, %v4200_v16  ;;  %v1148_v12 = vmul.f32 %v2317_v52, %v4214_v20  ;;  %2338 = vtanh.f32 %v647_v43 }
 0x139   : > { %v2321_v57 = vpop.eup %2320  ;;  %1657 = vst [vmem:[%s2667_s17 + $0x778] sm:$0xff] %v1401_v10  ;;  %v1403_v58 = vmin.f32 %v1147_v53, %v4207_v18  ;;  %v1149_v59 = vmul.f32 %v2319_v54, %v4221_v22  ;;  %2340 = vtanh.f32 %v648_v47 }
 0x13a   : > { %v2323_v14 = vpop.eup %2322  ;;  %1658 = vst [vmem:[%s2667_s17 + $0x780] sm:$0xff] %v1402_v55  ;;  %v1404_v60 = vmin.f32 %v1148_v12, %v4214_v20  ;;  %v1150_v62 = vmul.f32 %v2321_v57, %v4228_v24  ;;  %2342 = vtanh.f32 %v649_v50 }
 0x13b   : > { %v2325_v16 = vpop.eup %2324  ;;  %1659 = vst [vmem:[%s2667_s17 + $0x788] sm:$0xff] %v1403_v58  ;;  %v1405_v63 = vmin.f32 %v1149_v59, %v4221_v22  ;;  %v1151_v0 = vmul.f32 %v2323_v14, %v4235_v26 }
 0x13c   : > { %v2327_v18 = vpop.eup %2326  ;;  %1660 = vst [vmem:[%s2667_s17 + $0x790] sm:$0xff] %v1404_v60  ;;  %v1406_v1 = vmin.f32 %v1150_v62, %v4228_v24  ;;  %v1152_v3 = vmul.f32 %v2325_v16, %v4242_v28 }
 0x13d   : > { %v2329_v4 = vpop.eup %2328  ;;  %1661 = vst [vmem:[%s2667_s17 + $0x798] sm:$0xff] %v1405_v63  ;;  %v1407_v20 = vmin.f32 %v1151_v0, %v4235_v26  ;;  %v1153_v5 = vmul.f32 %v2327_v18, %v4249_v30 }
 0x13e   : > { %v2331_v6 = vpop.eup %2330  ;;  %1662 = vst [vmem:[%s2667_s17 + $0x7a0] sm:$0xff] %v1406_v1  ;;  %v1408_v22 = vmin.f32 %v1152_v3, %v4242_v28  ;;  %v1154_v9 = vmul.f32 %v2329_v4, %v4256_v33 }
 0x13f   : > { %v2333_v11 = vpop.eup %2332  ;;  %1663 = vst [vmem:[%s2667_s17 + $0x7a8] sm:$0xff] %v1407_v20  ;;  %v1409_v24 = vmin.f32 %v1153_v5, %v4249_v30  ;;  %v1155_v13 = vmul.f32 %v2331_v6, %v4263_v37 }
 0x140   : > { %v2335_v15 = vpop.eup %2334  ;;  %1664 = vst [vmem:[%s2667_s17 + $0x7b0] sm:$0xff] %v1408_v22  ;;  %v1410_v26 = vmin.f32 %v1154_v9, %v4256_v33  ;;  %v1156_v17 = vmul.f32 %v2333_v11, %v4270_v41 }
 0x141   : > { %v2337_v19 = vpop.eup %2336  ;;  %1665 = vst [vmem:[%s2667_s17 + $0x7b8] sm:$0xff] %v1409_v24  ;;  %v1411_v28 = vmin.f32 %v1155_v13, %v4263_v37  ;;  %v1157_v21 = vmul.f32 %v2335_v15, %v4277_v46 }
 0x142   : > { %v2339_v23 = vpop.eup %2338  ;;  %1666 = vst [vmem:[%s2667_s17 + $0x7c0] sm:$0xff] %v1410_v26  ;;  %v1412_v30 = vmin.f32 %v1156_v17, %v4270_v41  ;;  %v1158_v25 = vmul.f32 %v2337_v19, %v4284_v51 }
 0x143   : > { %v2341_v27 = vpop.eup %2340  ;;  %1667 = vst [vmem:[%s2667_s17 + $0x7c8] sm:$0xff] %v1411_v28  ;;  %v1413_v33 = vmin.f32 %v1157_v21, %v4277_v46  ;;  %v1159_v29 = vmul.f32 %v2339_v23, %v4291_v56 }
 0x144   : > { %v2343_v37 = vpop.eup %2342  ;;  %1668 = vst [vmem:[%s2667_s17 + $0x7d0] sm:$0xff] %v1412_v30  ;;  %v1414_v31 = vmin.f32 %v1158_v25, %v4284_v51  ;;  %v1160_v41 = vmul.f32 %v2341_v27, %v4298_v61 }
 0x145   : > { %1669 = vst [vmem:[%s2667_s17 + $0x7d8] sm:$0xff] %v1413_v33  ;;  %v1415_v32 = vmin.f32 %v1159_v29, %v4291_v56  ;;  %v1161_v34 = vmul.f32 %v2343_v37, %v4305_v39 }
 0x146   : > { %1670 = vst [vmem:[%s2667_s17 + $0x7e0] sm:$0xff] %v1414_v31  ;;  %v1416_v46 = vmin.f32 %v1160_v41, %v4298_v61 }
 0x147   : > { %1671 = vst [vmem:[%s2667_s17 + $0x7e8] sm:$0xff] %v1415_v32  ;;  %v1417_v51 = vmin.f32 %v1161_v34, %v4305_v39 }
 0x148   : > { %1672 = vst [vmem:[%s2667_s17 + $0x7f0] sm:$0xff] %v1416_v46 }
 0x149   : > { %1673 = vst [vmem:[%s2667_s17 + $0x7f8] sm:$0xff] %v1417_v51 }
 0x14a   : > { %2387 = shalt.err (!%p2384_p2)
}
 0x14b   : > { %s2388_s13 = scalar_lea.hbm %s4371_s29, 32768  ;;  %s2392_s20 = scalar_lea.hbm %s4422_s1, 65536 }
 0x14c   : > { %p2389_p4 = scmp.ne.s32.totalorder %s4371_s29, %s2388_s13  ;;  %p2393_p9 = scmp.lt.u32.totalorder %s4371_s29, %s4422_s1 }
 0x14d   : > { %p2394_p1 = scmp.lt.u32.totalorder %s2392_s20, %s2388_s13  ;;  %p2396_p6 = scmp.lt.u32.totalorder %s2388_s13, %s4371_s29 }
 0x14e   : > { %p2390_p5 = pnand %p2389_p4, %p4429_p11 }
 0x14f   : > { %p2395_p3 = por %p2394_p1, %p2393_p9 }
 0x150   : > { %p2391_p7 = pneg %p2390_p5 }
 0x151   : > { %p2397_p12 = por %p2396_p6, %p2395_p3 }
 0x153   : > { %p2398_p13 = pnand %p2397_p12, %p2391_p7 }
 0x155   : > { %2401 = shalt.err (!%p2398_p13)
}
 0x156   : > { %s2446_s24 = smov 4096   ;;  %s2447_s26 = smov 256  }
 0x157   : > { %1784 = dma.vmem_to_hbm [thread:$0]  (%p4429_p11), %s4373_s27, 32768, %s4371_s29, %s1675_s2, %s2446_s24, %s2446_s24, %s2447_s26  }
 0x158 PF: > { %s1704_s30 = sand.u32 1, %s2428_s6   ;;  %p4430_p8 = scmp.ne.s32.totalorder %s4427_s19, 0 }
 0x159   : > { %p4431_p10 = scmp.ge.s32.totalorder %s2440_s9, 2  ;;  %s1705_s17 = scalar_lea.sflag [#allocation4], %s1704_s30 }
 0x15b   : > { %p1791_p0 = pnand %p4431_p10, %p4430_p8 }
 0x15d   : > { %2423 = dma.done.wait (!%p1791_p0), %s1705_s17, 32768  }
 0x15e   : > { %2425 = vsyncadd (!%p1791_p0), %s1705_s17, 4294934528  ;;  %p14_p2 = scmp.ge.s32.totalorder %s2483_s12, 4   ;;  %s4432_s6 = smov %s2432_s7 }
 0x15f   : > { %s4433_s7 = smov %s2436_s8  ;;  %s4434_s8 = smov %s2495_s15 }
 0x160   : > { %s4435_s9 = smov %s2483_s12  ;;  %16 = sbr.rel (!%p14_p2) target bundleno = 5 (0x5), region = 69 }
 0x167   :  { %1710 = vsyncpa [#allocation3], 1 }
 0x168   :  { %1712 = vsyncpa [#allocation3 + $0x1], 1 }
 0x169   :  { %1713 = vsyncpa [#allocation4], 1 }
 0x16a   :  { %1715 = vsyncpa [#allocation4 + $0x1], 1 }

</bundles_post_ra>
